<compile_context>
chip_gen: v7x
topology: tpu7x:2x2x1
jax: 0.10.0
libtpu: 0.0.40
codegen_flags: <defaults>
</compile_context>

<pallas_src>
import math

import jax
import jax.numpy as jnp
from jax import lax
from jax.experimental import pallas as pl
from jax.experimental.pallas import tpu as pltpu

_NEG_INF = float("-inf")  # Python literal only -> no captured traced constants.


def _suffix_lse(s_sorted, n):
    """lse[:, j] = logsumexp(s_sorted[:, j:]) via a Hillis–Steele scan on (max, sumexp)."""
    tb = s_sorted.shape[0]
    col = lax.broadcasted_iota(jnp.int32, (tb, n), 1)  # hoisted once, reused every step
    m = s_sorted
    z = jnp.ones_like(s_sorted)
    t = 1
    while t < n:  # unrolled at trace time: ceil(log2 N) steps
        # Left-shift by t: XLU rotate by (n - t) (== -t mod n), then splat the scan
        # identity (-inf, 0) into the wrapped tail with one cheap VPU select.
        wrap = col >= (n - t)
        m_sh = jnp.where(wrap, _NEG_INF, pltpu.roll(m, shift=n - t, axis=1))
        z_sh = jnp.where(wrap, 0.0, pltpu.roll(z, shift=n - t, axis=1))
        # Single-exp combine: max(m, m_sh) makes one of the two exponents exactly 0.
        ge = m >= m_sh
        e = jnp.exp(-jnp.abs(m - m_sh))  # exp(-inf) = 0 handles the -inf identity
        z = jnp.where(ge, z + z_sh * e, z * e + z_sh)
        m = jnp.where(ge, m, m_sh)
        t *= 2
    return m + jnp.log(z)


def _make_kernel(n, tile_b, batch, presorted):
    inv_block = 1.0 / (8.0 * 128.0)

    def _finish(s_sorted, out_ref):
        lse = _suffix_lse(s_sorted, n)
        tb = s_sorted.shape[0]
        # Mask padded batch rows (wrapper pads B up to a multiple of TB).
        row = pl.program_id(0) * tile_b + lax.broadcasted_iota(jnp.int32, (tb, 1), 0)
        valid = (row < batch).astype(jnp.float32)
        partial = jnp.sum((lse - s_sorted) * valid)
        # Lane-dense, disjoint (1, 8, 128) block per tile; pre-divide by the block size
        # so the wrapper reduction is a plain dense jnp.sum over the whole output.
        out_ref[...] = jnp.broadcast_to(partial * inv_block, out_ref.shape)

    if presorted:
        def kernel(s_sorted_ref, out_ref):
            _finish(s_sorted_ref[...].astype(jnp.float32), out_ref)
    else:
        def kernel(scores_ref, order_ref, out_ref):
            s = scores_ref[...].astype(jnp.float32)   # (TB, N)
            o = order_ref[...].astype(jnp.int32)      # (TB, N), ranks 1..N
            # One-hot rank gather: s_sorted[b, j] = score of the item with order == j+1.
            rank = lax.broadcasted_iota(jnp.int32, (1, 1, n), 2) + 1
            sel = jnp.where(o[:, :, None] == rank, s[:, :, None], 0.0)  # (TB, N, N)
            _finish(jnp.sum(sel, axis=1), out_ref)

    return kernel


def _choose_tile_b(batch, n, presorted, budget_bytes):
    """Largest sublane-aligned batch tile whose live VMEM fits the per-tile budget."""
    # Dominant live bytes per batch row: the (TB,N,N) one-hot select for the in-kernel
    # gather path; otherwise a handful of (TB,N) f32 temps + double-buffered I/O.
    per_row = ((n * n + 24 * n) if not presorted else 24 * n) * 4
    tb = (budget_bytes // max(per_row, 1)) // 8 * 8
    tb = max(8, tb)
    full = ((batch + 7) // 8) * 8
    if batch > 8:
        # Keep at least 2 grid steps -> both v7x TensorCores get work ("parallel" axis).
        half = (((batch + 1) // 2) + 7) // 8 * 8
        tb = min(tb, half)
    return max(8, min(tb, full))


def exploded_logit_loss(scores, order, *, gather_in_kernel_max_n=256,
                        vmem_tile_budget_bytes=24 * 1024 * 1024):
    """NLL exploded-logit loss (loss_type='nll', reduction='mean', top_n=None).

    scores: (B, N) float; order: (B, N) int, each row a 1-indexed permutation of 1..N.
    """
    scores = jnp.asarray(scores, jnp.float32)
    order = jnp.asarray(order, jnp.int32)
    if scores.ndim != 2:
        raise ValueError("expected 2-D scores (batch, n_items)")
    B, N = scores.shape

    presorted = N > gather_in_kernel_max_n
    if presorted:
        # Long lists: do the rank gather with XLA (argsort + take_along_axis) so the
        # kernel is only the O(N logN) scan and holds no (TB, N, N) intermediate.
        perm = jnp.argsort(order, axis=-1)
        s_sorted = jnp.take_along_axis(scores, perm, axis=-1)
        ins = [s_sorted]
    else:
        ins = [scores, order]

    TB = _choose_tile_b(B, N, presorted, vmem_tile_budget_bytes)
    min_bytes = 8 * (((N * N + 24 * N) if not presorted else 24 * N) * 4)
    if min_bytes > 44 * 1024 * 1024:
        raise ValueError("n_items too large for a single tile along the list axis; "
                         "tile the list dimension as well")

    B_pad = ((B + TB - 1) // TB) * TB
    if B_pad != B:
        pad = B_pad - B
        if presorted:
            ins = [jnp.concatenate([ins[0], jnp.zeros((pad, N), jnp.float32)], axis=0)]
        else:
            dummy = jnp.broadcast_to(jnp.arange(1, N + 1, dtype=jnp.int32), (pad, N))
            ins = [jnp.concatenate([ins[0], jnp.zeros((pad, N), jnp.float32)], axis=0),
                   jnp.concatenate([ins[1], dummy], axis=0)]
    num_tiles = B_pad // TB

    log_steps = max(int(math.ceil(math.log2(N))), 1) if N > 1 else 0
    flops = B_pad * N * (10 * log_steps + (2 * N if not presorted else 0))
    cost = pl.CostEstimate(
        flops=int(flops),
        transcendentals=int(B_pad * N * (log_steps + 1)),
        bytes_accessed=int(sum(int(x.size) * 4 for x in ins) + num_tiles * 8 * 128 * 4),
    )

    partials = pl.pallas_call(
        _make_kernel(N, TB, B, presorted),
        out_shape=jax.ShapeDtypeStruct((num_tiles, 8, 128), jnp.float32),
        grid_spec=pltpu.PrefetchScalarGridSpec(
            num_scalar_prefetch=0,
            grid=(num_tiles,),
            in_specs=[pl.BlockSpec((TB, N), lambda t: (t, 0)) for _ in ins],
            out_specs=pl.BlockSpec((1, 8, 128), lambda t: (t, 0, 0)),
        ),
        compiler_params=pltpu.CompilerParams(
            dimension_semantics=("parallel",),
            vmem_limit_bytes=48 * 1024 * 1024,
        ),
        cost_estimate=cost,
    )(*ins)

    # Every tile wrote (its partial sum)/1024 across its whole (8,128) block.
    return jnp.sum(partials) / jnp.float32(B * N)


def reference_loss(scores, order):
    """Pure-JAX reference mirroring the PyTorch forward (nll / mean)."""
    N = scores.shape[-1]
    j = jnp.arange(N)
    exploded = jnp.where(order[:, :, None] > j[None, None, :],
                         scores[:, :, None], -jnp.inf)
    lse = jax.scipy.special.logsumexp(exploded, axis=1)          # (B, N_rounds)
    target = jnp.argsort(order, axis=-1)                         # (B, N_rounds)
    tgt_score = jnp.take_along_axis(scores, target, axis=-1)     # (B, N_rounds)
    return jnp.mean(lse - tgt_score)


if __name__ == "__main__":
    key = jax.random.PRNGKey(0)
    k1, k2, k3, k4 = jax.random.split(key, 4)

    # Case 1: short list -> in-kernel one-hot gather path; exercises batch padding
    # (10 -> 16), a 2-tile grid, and padded-row masking.
    B, N = 10, 16
    scores = jax.random.normal(k1, (B, N), dtype=jnp.float32)
    order = jnp.argsort(jax.random.uniform(k2, (B, N)), axis=-1).astype(jnp.int32) + 1
    loss = jax.block_until_ready(exploded_logit_loss(scores, order))
    ref = reference_loss(scores, order)
    assert jnp.isfinite(loss), "kernel produced non-finite loss"
    assert jnp.allclose(loss, ref, rtol=1e-5, atol=1e-5), (loss, ref)

    # Case 2: longer list -> wrapper-side rank gather, kernel runs only the suffix-LSE scan.
    B2, N2 = 4, 300
    scores2 = jax.random.normal(k3, (B2, N2), dtype=jnp.float32)
    order2 = jnp.argsort(jax.random.uniform(k4, (B2, N2)), axis=-1).astype(jnp.int32) + 1
    loss2 = jax.block_until_ready(exploded_logit_loss(scores2, order2))
    ref2 = reference_loss(scores2, order2)
    assert jnp.isfinite(loss2), "kernel produced non-finite loss"
    assert jnp.allclose(loss2, ref2, rtol=1e-5, atol=1e-5), (loss2, ref2)

    print("KERNEL_OK")
</pallas_src>

<mosaic_0001>
module attributes {stable_mosaic.version = 11 : i64} {
  func.func @kernel(%arg0: i32, %arg1: memref<8x16xf32, #tpu.memory_space<vmem>>, %arg2: memref<8x16xi32, #tpu.memory_space<vmem>>, %arg3: memref<1x8x128xf32, #tpu.memory_space<vmem>>) attributes {dimension_semantics = [#tpu.dimension_semantics<parallel>], iteration_bounds = array<i64: 2>, scalar_prefetch = 0 : i64, scratch_operands = 0 : i64, tpu.core_type = #tpu.core_type<tc>, window_params = [{transform_indices = @transform_0, window_bounds = array<i64: 8, 16>}, {transform_indices = @transform_1, window_bounds = array<i64: 8, 16>}, {transform_indices = @transform_2, window_bounds = array<i64: 1, 8, 128>}]} {
    %c0 = arith.constant 0 : index
    %c0_0 = arith.constant 0 : index
    %0 = vector.load %arg1[%c0, %c0_0] : memref<8x16xf32, #tpu.memory_space<vmem>>, vector<8x16xf32>
    %c0_1 = arith.constant 0 : index
    %c0_2 = arith.constant 0 : index
    %1 = vector.load %arg2[%c0_1, %c0_2] : memref<8x16xi32, #tpu.memory_space<vmem>>, vector<8x16xi32>
    %2 = tpu.iota {dimensions = array<i32: 2>} : vector<1x1x16xi32>
    %c1_i32 = arith.constant 1 : i32
    %3 = vector.broadcast %c1_i32 : i32 to vector<1x1x16xi32>
    %4 = arith.addi %2, %3 : vector<1x1x16xi32>
    %5 = vector.shape_cast %1 : vector<8x16xi32> to vector<8x16x1xi32>
    %6 = vector.broadcast %5 : vector<8x16x1xi32> to vector<8x16x16xi32>
    %7 = vector.broadcast %4 : vector<1x1x16xi32> to vector<8x16x16xi32>
    %8 = arith.cmpi eq, %6, %7 : vector<8x16x16xi32>
    %9 = vector.shape_cast %0 : vector<8x16xf32> to vector<8x16x1xf32>
    %cst = arith.constant 0.000000e+00 : f32
    %10 = vector.shape_cast %9 : vector<8x16x1xf32> to vector<8x16x1xf32>
    %11 = vector.broadcast %10 : vector<8x16x1xf32> to vector<8x16x16xf32>
    %12 = vector.broadcast %cst : f32 to vector<8x16x16xf32>
    %13 = arith.select %8, %11, %12 : vector<8x16x16xi1>, vector<8x16x16xf32>
    %cst_3 = arith.constant dense<0.000000e+00> : vector<8x16xf32>
    %14 = vector.multi_reduction <add>, %13, %cst_3 [1] : vector<8x16x16xf32> to vector<8x16xf32>
    %15 = tpu.iota {dimensions = array<i32: 1>} : vector<8x16xi32>
    %cst_4 = arith.constant 1.000000e+00 : f32
    %16 = vector.broadcast %cst_4 : f32 to vector<8x16xf32>
    %c15_i32 = arith.constant 15 : i32
    %17 = vector.broadcast %c15_i32 : i32 to vector<8x16xi32>
    %18 = arith.cmpi sge, %15, %17 : vector<8x16xi32>
    %c15_i32_5 = arith.constant 15 : i32
    %19 = tpu.dynamic_rotate %14 by %c15_i32_5 dim 1 : vector<8x16xf32>, i32 -> vector<8x16xf32>
    %cst_6 = arith.constant 0xFF800000 : f32
    %20 = vector.broadcast %cst_6 : f32 to vector<8x16xf32>
    %21 = arith.select %18, %20, %19 : vector<8x16xi1>, vector<8x16xf32>
    %c15_i32_7 = arith.constant 15 : i32
    %22 = tpu.dynamic_rotate %16 by %c15_i32_7 dim 1 : vector<8x16xf32>, i32 -> vector<8x16xf32>
    %cst_8 = arith.constant 0.000000e+00 : f32
    %23 = vector.broadcast %cst_8 : f32 to vector<8x16xf32>
    %24 = arith.select %18, %23, %22 : vector<8x16xi1>, vector<8x16xf32>
    %25 = arith.cmpf oge, %14, %21 : vector<8x16xf32>
    %26 = arith.subf %14, %21 : vector<8x16xf32>
    %27 = math.absf %26 : vector<8x16xf32>
    %cst_9 = arith.constant 0.000000e+00 : f32
    %28 = vector.broadcast %cst_9 : f32 to vector<8x16xf32>
    %29 = arith.subf %28, %27 : vector<8x16xf32>
    %30 = math.exp %29 : vector<8x16xf32>
    %31 = arith.mulf %24, %30 : vector<8x16xf32>
    %32 = arith.addf %16, %31 : vector<8x16xf32>
    %33 = arith.mulf %16, %30 : vector<8x16xf32>
    %34 = arith.addf %33, %24 : vector<8x16xf32>
    %35 = arith.select %25, %32, %34 : vector<8x16xi1>, vector<8x16xf32>
    %36 = arith.select %25, %14, %21 : vector<8x16xi1>, vector<8x16xf32>
    %c14_i32 = arith.constant 14 : i32
    %37 = vector.broadcast %c14_i32 : i32 to vector<8x16xi32>
    %38 = arith.cmpi sge, %15, %37 : vector<8x16xi32>
    %c14_i32_10 = arith.constant 14 : i32
    %39 = tpu.dynamic_rotate %36 by %c14_i32_10 dim 1 : vector<8x16xf32>, i32 -> vector<8x16xf32>
    %cst_11 = arith.constant 0xFF800000 : f32
    %40 = vector.broadcast %cst_11 : f32 to vector<8x16xf32>
    %41 = arith.select %38, %40, %39 : vector<8x16xi1>, vector<8x16xf32>
    %c14_i32_12 = arith.constant 14 : i32
    %42 = tpu.dynamic_rotate %35 by %c14_i32_12 dim 1 : vector<8x16xf32>, i32 -> vector<8x16xf32>
    %cst_13 = arith.constant 0.000000e+00 : f32
    %43 = vector.broadcast %cst_13 : f32 to vector<8x16xf32>
    %44 = arith.select %38, %43, %42 : vector<8x16xi1>, vector<8x16xf32>
    %45 = arith.cmpf oge, %36, %41 : vector<8x16xf32>
    %46 = arith.subf %36, %41 : vector<8x16xf32>
    %47 = math.absf %46 : vector<8x16xf32>
    %cst_14 = arith.constant 0.000000e+00 : f32
    %48 = vector.broadcast %cst_14 : f32 to vector<8x16xf32>
    %49 = arith.subf %48, %47 : vector<8x16xf32>
    %50 = math.exp %49 : vector<8x16xf32>
    %51 = arith.mulf %44, %50 : vector<8x16xf32>
    %52 = arith.addf %35, %51 : vector<8x16xf32>
    %53 = arith.mulf %35, %50 : vector<8x16xf32>
    %54 = arith.addf %53, %44 : vector<8x16xf32>
    %55 = arith.select %45, %52, %54 : vector<8x16xi1>, vector<8x16xf32>
    %56 = arith.select %45, %36, %41 : vector<8x16xi1>, vector<8x16xf32>
    %c12_i32 = arith.constant 12 : i32
    %57 = vector.broadcast %c12_i32 : i32 to vector<8x16xi32>
    %58 = arith.cmpi sge, %15, %57 : vector<8x16xi32>
    %c12_i32_15 = arith.constant 12 : i32
    %59 = tpu.dynamic_rotate %56 by %c12_i32_15 dim 1 : vector<8x16xf32>, i32 -> vector<8x16xf32>
    %cst_16 = arith.constant 0xFF800000 : f32
    %60 = vector.broadcast %cst_16 : f32 to vector<8x16xf32>
    %61 = arith.select %58, %60, %59 : vector<8x16xi1>, vector<8x16xf32>
    %c12_i32_17 = arith.constant 12 : i32
    %62 = tpu.dynamic_rotate %55 by %c12_i32_17 dim 1 : vector<8x16xf32>, i32 -> vector<8x16xf32>
    %cst_18 = arith.constant 0.000000e+00 : f32
    %63 = vector.broadcast %cst_18 : f32 to vector<8x16xf32>
    %64 = arith.select %58, %63, %62 : vector<8x16xi1>, vector<8x16xf32>
    %65 = arith.cmpf oge, %56, %61 : vector<8x16xf32>
    %66 = arith.subf %56, %61 : vector<8x16xf32>
    %67 = math.absf %66 : vector<8x16xf32>
    %cst_19 = arith.constant 0.000000e+00 : f32
    %68 = vector.broadcast %cst_19 : f32 to vector<8x16xf32>
    %69 = arith.subf %68, %67 : vector<8x16xf32>
    %70 = math.exp %69 : vector<8x16xf32>
    %71 = arith.mulf %64, %70 : vector<8x16xf32>
    %72 = arith.addf %55, %71 : vector<8x16xf32>
    %73 = arith.mulf %55, %70 : vector<8x16xf32>
    %74 = arith.addf %73, %64 : vector<8x16xf32>
    %75 = arith.select %65, %72, %74 : vector<8x16xi1>, vector<8x16xf32>
    %76 = arith.select %65, %56, %61 : vector<8x16xi1>, vector<8x16xf32>
    %c8_i32 = arith.constant 8 : i32
    %77 = vector.broadcast %c8_i32 : i32 to vector<8x16xi32>
    %78 = arith.cmpi sge, %15, %77 : vector<8x16xi32>
    %c8_i32_20 = arith.constant 8 : i32
    %79 = tpu.dynamic_rotate %76 by %c8_i32_20 dim 1 : vector<8x16xf32>, i32 -> vector<8x16xf32>
    %cst_21 = arith.constant 0xFF800000 : f32
    %80 = vector.broadcast %cst_21 : f32 to vector<8x16xf32>
    %81 = arith.select %78, %80, %79 : vector<8x16xi1>, vector<8x16xf32>
    %c8_i32_22 = arith.constant 8 : i32
    %82 = tpu.dynamic_rotate %75 by %c8_i32_22 dim 1 : vector<8x16xf32>, i32 -> vector<8x16xf32>
    %cst_23 = arith.constant 0.000000e+00 : f32
    %83 = vector.broadcast %cst_23 : f32 to vector<8x16xf32>
    %84 = arith.select %78, %83, %82 : vector<8x16xi1>, vector<8x16xf32>
    %85 = arith.cmpf oge, %76, %81 : vector<8x16xf32>
    %86 = arith.subf %76, %81 : vector<8x16xf32>
    %87 = math.absf %86 : vector<8x16xf32>
    %cst_24 = arith.constant 0.000000e+00 : f32
    %88 = vector.broadcast %cst_24 : f32 to vector<8x16xf32>
    %89 = arith.subf %88, %87 : vector<8x16xf32>
    %90 = math.exp %89 : vector<8x16xf32>
    %91 = arith.mulf %84, %90 : vector<8x16xf32>
    %92 = arith.addf %75, %91 : vector<8x16xf32>
    %93 = arith.mulf %75, %90 : vector<8x16xf32>
    %94 = arith.addf %93, %84 : vector<8x16xf32>
    %95 = arith.select %85, %92, %94 : vector<8x16xi1>, vector<8x16xf32>
    %96 = arith.select %85, %76, %81 : vector<8x16xi1>, vector<8x16xf32>
    %97 = math.log %95 : vector<8x16xf32>
    %98 = arith.addf %96, %97 : vector<8x16xf32>
    %c8_i32_25 = arith.constant 8 : i32
    %99 = arith.muli %arg0, %c8_i32_25 : i32
    %100 = tpu.iota {dimensions = array<i32: 0>} : vector<8x1xi32>
    %101 = vector.broadcast %99 : i32 to vector<8x1xi32>
    %102 = arith.addi %101, %100 : vector<8x1xi32>
    %c10_i32 = arith.constant 10 : i32
    %103 = vector.broadcast %c10_i32 : i32 to vector<8x1xi32>
    %104 = arith.cmpi slt, %102, %103 : vector<8x1xi32>
    %105 = arith.extui %104 : vector<8x1xi1> to vector<8x1xi32>
    %106 = arith.sitofp %105 : vector<8x1xi32> to vector<8x1xf32>
    %107 = arith.subf %98, %14 : vector<8x16xf32>
    %108 = vector.broadcast %106 : vector<8x1xf32> to vector<8x16xf32>
    %109 = arith.mulf %107, %108 : vector<8x16xf32>
    %110 = vector.shape_cast %109 : vector<8x16xf32> to vector<1x8x16xf32>
    %cst_26 = arith.constant dense<0.000000e+00> : vector<1xf32>
    %111 = vector.multi_reduction <add>, %110, %cst_26 [1, 2] : vector<1x8x16xf32> to vector<1xf32>
    %112 = vector.shape_cast %111 : vector<1xf32> to vector<1x1x1xf32>
    %113 = vector.extract %112[0, 0, 0] : f32 from vector<1x1x1xf32>
    %cst_27 = arith.constant 9.765625E-4 : f32
    %114 = arith.mulf %113, %cst_27 : f32
    %115 = vector.broadcast %114 : f32 to vector<1x8x128xf32>
    %c0_28 = arith.constant 0 : index
    %c0_29 = arith.constant 0 : index
    %c0_30 = arith.constant 0 : index
    %116 = vector.load %arg3[%c0_28, %c0_29, %c0_30] : memref<1x8x128xf32, #tpu.memory_space<vmem>>, vector<1x8x128xf32>
    tpu.vector_store %arg3[%c0_28, %c0_29, %c0_30], %115 {strides = array<i32>} : memref<1x8x128xf32, #tpu.memory_space<vmem>>, vector<1x8x128xf32>,
    return
  }
  func.func @transform_0(%arg0: i32) -> (i32, i32) {
    %c0_i32 = arith.constant 0 : i32
    %c0_i32_0 = arith.constant 0 : i32
    return %arg0, %c0_i32 : i32, i32
  }
  func.func @transform_1(%arg0: i32) -> (i32, i32) {
    %c0_i32 = arith.constant 0 : i32
    %c0_i32_0 = arith.constant 0 : i32
    return %arg0, %c0_i32 : i32, i32
  }
  func.func @transform_2(%arg0: i32) -> (i32, i32, i32) {
    %c0_i32 = arith.constant 0 : i32
    %c0_i32_0 = arith.constant 0 : i32
    %c0_i32_1 = arith.constant 0 : i32
    return %arg0, %c0_i32, %c0_i32_0 : i32, i32, i32
  }
}

</mosaic_0001>

<bundles_post_ra>
// kernel: tpu_custom_call.1
= control target key start
LH: loop header
LB: loop body
LE: loop exit
PB: predicated region body
PF: predicated region fallthrough
CT: control target
= control target key end

     0   :  { %7 = vsyncpa [#allocation3], 0  ;;  %s3035_s0 = inlined_call_operand.hbm [shape: f32[16,16], index: 0, kind: input, shape index: {}]   ;;  %s3036_s1 = inlined_call_operand.hbm [shape: s32[16,16], index: 1, kind: input, shape index: {}]   ;;  %s3037_s2 = inlined_call_operand.hbm [shape: f32[2,8,128], index: 2, kind: output, shape index: {}]  }
   0x1   :  { %9 = vsyncpa [#allocation3 + $0x1], 0 }
   0x2   :  { %10 = vsyncpa [#allocation6], 0 }
   0x3   :  { %12 = vsyncpa [#allocation6 + $0x1], 0 }
   0x4   :  { %13 = vsyncpa [#allocation4], 0 }
   0x5   :  { %15 = vsyncpa [#allocation4 + $0x1], 0  ;;  %s1882_s9 = smov 0   ;;  %s1884_s10 = smov 0  }
   0x6   :  { %s1886_s11 = smov 0   ;;  %s1888_s12 = smov 0  }
   0x7 LB: > { %s1903_s13 = sadd.s32 4294967295, %s1855_s12   ;;  %s1568_s14 = sadd.s32 4294967294, %s1855_s12   ;;  %s1855_s12 = sphi %s1888_s12, %s3098_s12   ;;  %s1851_s11 = sphi %s1886_s11, %s3097_s11   ;;  %s1847_s10 = sphi %s1884_s10, %s3096_s10   ;;  %s1843_s9 = sphi %s1882_s9, %s3095_s9  }
   0x8   : > { %s1907_s15 = sadd.s32 1, %s1855_s12   ;;  %s28_s16 = sadd.s32 1, %s1851_s11 }
   0x9   : > { %s25_s17 = ssub.s32 %s1855_s12, %s1907_s15  ;;  %p35_p0 = scmp.ne.s32.totalorder %s1851_s11, %s1847_s10 }
   0xa   : > { %p26_p1 = scmp.eq.s32.totalorder %s25_s17, 0  ;;  %p36_p2 = scmp.eq.s32.totalorder %s1855_s12, 0 }
   0xb   : > { %p41_p3 = scmp.ne.s32.totalorder %s1847_s10, %s1843_s9  ;;  %p42_p4 = scmp.eq.s32.totalorder %s1903_s13, 0 }
   0xc   : > { %s1919_s18 = scalar_select %p26_p1, %s1851_s11, %s28_s16  }
   0xd   : > { %p1921_p5 = por %p36_p2, %p35_p0  ;;  %p1925_p6 = por %p42_p4, %p41_p3 }
   0xe   : > { %p91_p7 = scmp.eq.s32.totalorder %s1903_s13, 1  ;;  %p97_p8 = scmp.eq.s32.totalorder %s1568_s14, 1 }
   0xf   : > { %s3052_s20 = scalar_select %p1925_p6, 1, 0 }
  0x10   : > { %p1604_p10 = scmp.lt.s32.totalorder %s1855_s12, 2  ;;  %p1932_p11 = por %p91_p7, %p35_p0 }
  0x11   : > { %p1936_p12 = por %p97_p8, %p41_p3  ;;  %s1941_s23 = sand.u32 1, %s1851_s11  }
  0x12   : > { %s3053_s21 = scalar_select %p1932_p11, 1, 0 }
  0x13   : > { %s3054_s22 = scalar_select %p1936_p12, 1, 0 }
  0x14   : > { %s1572_s24 = sshll.u32 %s1855_s12, 7  ;;  %s1571_s25 = sshll.u32 %s1941_s23, 3 }
  0x15   : > { %s1950_s28 = scalar_lea.hbm %s3035_s0, %s1572_s24  ;;  %s121_s29 = scalar_lea.vmem [#allocation2], %s1571_s25 }
  0x16   : > { %s128_s30 = sshll.u32 %s121_s29, 4  ;;  %p1956_p13 = pnand %p1604_p10, %p1921_p5  ;;  %s1960_s30 = int_to_ptr.vmem [resolvable:$true] %s128_s30 }
  0x17   : > { %s118_s4 = scalar_lea.sflag [#allocation3], %s1941_s23  ;;  %s1725_s5 = scalar_lea.hbm %s1950_s28, 128 }
  0x18   : > { %p1726_p2 = scmp.ne.s32.totalorder %s1950_s28, %s1725_s5  ;;  %p1727_p3 = pneg %p1956_p13 }
  0x19   : > { %s1730_s8 = scalar_lea.hbm %s3035_s0, 256  ;;  %p1731_p5 = scmp.lt.u32.totalorder %s1950_s28, %s3035_s0 }
  0x1a   : > { %p1728_p4 = pnand %p1727_p3, %p1726_p2  ;;  %p1732_p8 = scmp.lt.u32.totalorder %s1730_s8, %s1725_s5 }
  0x1b   : > { %p1734_p9 = scmp.lt.u32.totalorder %s1725_s5, %s1950_s28 }
  0x1c   : > { %p1729_p7 = pneg %p1728_p4  ;;  %p1733_p10 = por %p1732_p8, %p1731_p5 }
  0x1e   : > { %p1735_p0 = por %p1734_p9, %p1733_p10 }
  0x20   : > { %p1736_p1 = pnand %p1735_p0, %p1729_p7 }
  0x22   : > { %1739 = shalt.err (!%p1736_p1)
}
  0x23   : > { %s1740_s17 = scalar_lea.vmem %s1960_s30, 128  ;;  %s1857_s19 = smov [#allocation2]  }
  0x24   : > { %p1741_p2 = scmp.ne.s32.totalorder %s1960_s30, %s1740_s17  ;;  %s1745_s26 = sshll.u32 %s1857_s19, 4  ;;  %s1746_s26 = int_to_ptr.vmem [resolvable:$false] %s1745_s26 }
  0x25   : > { %s1747_s27 = scalar_lea.vmem %s1746_s26, 256  ;;  %p1748_p11 = scmp.lt.s32.totalorder %s1960_s30, %s1746_s26 }
  0x26   : > { %p1743_p4 = pnand %p1741_p2, %p1727_p3  ;;  %p1749_p5 = scmp.lt.s32.totalorder %s1747_s27, %s1740_s17 }
  0x28   : > { %p1744_p12 = pneg %p1743_p4  ;;  %p1750_p8 = por %p1749_p5, %p1748_p11 }
  0x2a   : > { %p1751_p9 = pnand %p1750_p8, %p1744_p12 }
  0x2c   : > { %1754 = shalt.err (!%p1751_p9)
}
  0x2d   : > { %1596 = dma.hbm_to_vmem [thread:$0]  (!%p1956_p13), %s1950_s28, 128, %s1960_s30, %s118_s4  }
  0x2e   : > { %p3056_p0 = scmp.lt.s32.totalorder %s1855_s12, 3  ;;  %p3057_p1 = scmp.ge.s32.totalorder %s1855_s12, 1 }
  0x2f   : > { %s2003_s7 = scalar_lea.hbm %s3036_s1, %s1572_s24  ;;  %s139_s8 = scalar_lea.vmem [#allocation5], %s1571_s25 }
  0x30   : > { %p1994_p7 = pnand %p3057_p1, %p3056_p0  ;;  %s146_s14 = sshll.u32 %s139_s8, 4  ;;  %s147_s14 = int_to_ptr.vmem [resolvable:$true] %s146_s14 }
  0x31   : > { %s136_s28 = scalar_lea.sflag [#allocation6], %s1941_s23  ;;  %s1755_s30 = scalar_lea.hbm %s2003_s7, 128 }
  0x32   : > { %s3058_s29 = scalar_select %p1994_p7, 1, 0 }
  0x33   : > { %p1756_p11 = scmp.ne.s32.totalorder %s2003_s7, %s1755_s30  ;;  %s1760_s24 = scalar_lea.hbm %s3036_s1, 256 }
  0x34   : > { %p1761_p2 = scmp.lt.u32.totalorder %s2003_s7, %s3036_s1  ;;  %p1762_p4 = scmp.lt.u32.totalorder %s1760_s24, %s1755_s30 }
  0x35   : > { %p1758_p12 = pnand %p1756_p11, %p1727_p3  ;;  %p1764_p8 = scmp.lt.u32.totalorder %s1755_s30, %s2003_s7 }
  0x36   : > { %p1763_p5 = por %p1762_p4, %p1761_p2 }
  0x37   : > { %p1759_p10 = pneg %p1758_p12 }
  0x38   : > { %p1765_p9 = por %p1764_p8, %p1763_p5 }
  0x3a   : > { %p1766_p0 = pnand %p1765_p9, %p1759_p10 }
  0x3c   : > { %1769 = shalt.err (!%p1766_p0)
}
  0x3d   : > { %s1770_s23 = scalar_lea.vmem %s147_s14, 128  ;;  %s1858_s25 = smov [#allocation5]  }
  0x3e   : > { %p1771_p1 = scmp.ne.s32.totalorder %s147_s14, %s1770_s23  ;;  %s1775_s26 = sshll.u32 %s1858_s25, 4  ;;  %s1776_s26 = int_to_ptr.vmem [resolvable:$false] %s1775_s26 }
  0x3f   : > { %s1777_s27 = scalar_lea.vmem %s1776_s26, 256  ;;  %p1778_p6 = scmp.lt.s32.totalorder %s147_s14, %s1776_s26 }
  0x40   : > { %p1773_p11 = pnand %p1771_p1, %p1727_p3  ;;  %p1779_p7 = scmp.lt.s32.totalorder %s1777_s27, %s1770_s23 }
  0x42   : > { %p1774_p12 = pneg %p1773_p11  ;;  %p1780_p2 = por %p1779_p7, %p1778_p6 }
  0x44   : > { %p1781_p4 = pnand %p1780_p2, %p1774_p12 }
  0x46   : > { %1784 = shalt.err (!%p1781_p4)
}
  0x47   : > { %1599 = dma.hbm_to_vmem [thread:$0]  (!%p1956_p13), %s2003_s7, 128, %s147_s14, %s136_s28  }
  0x48   : > { %p3059_p10 = scmp.ne.s32.totalorder %s3058_s29, 0 }
  0x4a   : > { %155 = sbr.rel (%p3059_p10) target bundleno = 2036 (0x7f4), region = 28 }
  0x51   : > { %s2030_s5 = sand.u32 1, %s1847_s10   ;;  %p3060_p6 = scmp.ne.s32.totalorder %s3052_s20, 0 }
  0x52   : > { %s2033_s6 = sshll.u32 %s2030_s5, 3  ;;  %s158_s8 = scalar_lea.sflag [#allocation3], %s2030_s5 }
  0x53   : > { %s161_s30 = scalar_lea.vmem [#allocation2], %s2033_s6 }
  0x54   : > { %1830 = dma.done.wait (%p3060_p6), %s158_s8, 128  }
  0x55   : > { %1832 = vsyncadd (%p3060_p6), %s158_s8, 4294967168  ;;  %s167_s3 = scalar_lea.sflag [#allocation6], %s2030_s5  ;;  %s170_s29 = scalar_lea.vmem [#allocation5], %s2033_s6 }
  0x56   : > { %1834 = dma.done.wait (%p3060_p6), %s167_s3, 128  }
  0x57   : > { %1836 = vsyncadd (%p3060_p6), %s167_s3, 4294967168  ;;  %v198_v0 = vlaneseq  ;;  %v197_v4 = vld [vmem:[%s170_s29] sm:$0xff]  ;;  %v196_v9 = vld [vmem:[%s161_s30] sm:$0xff]  ;;  %v1859_v28 = vmov 1.0   ;;  %s1860_s20 = smov 16   ;;  %vm3040_vm2 = vcmask 130048  }
  0x58   : > { %s1861_s7 = smov 127   ;;  %s1862_s14 = smov 126  }
  0x59   : > { %v2048_v1 = vshrl.u32 %v198_v0, 7  ;;  %v2060_v43 = vand.u32 127, %v198_v0  ;;  %s1863_s28 = smov 124   ;;  %s1864_s4 = smov 120  }
  0x5a   : > { %s1579_s16 = sshll.u32 %s1903_s13, 3  ;;  %s195_s24 = scalar_lea.vmem [#allocation7], %s2033_s6 }
  0x5b   : > { %3061 = vst [vmem:[#allocation11_spill] sm:$0xff] %v2048_v1  ;;  %v214_v2 = vsub.s32 1, %v2048_v1  ;;  %v203_v3 = vsub.s32 0, %v2048_v1  ;;  %v225_v7 = vsub.s32 2, %v2048_v1  ;;  %v236_v12 = vsub.s32 3, %v2048_v1  ;;  %s1475_s17 = sshll.u32 %s195_s24, 4  ;;  %s2993_s17 = int_to_ptr.vmem [resolvable:$true] %s1475_s17 }
  0x5c   : > { %v247_v15 = vsub.s32 4, %v2048_v1  ;;  %v258_v18 = vsub.s32 5, %v2048_v1  ;;  %v269_v21 = vsub.s32 6, %v2048_v1  ;;  %v280_v24 = vsub.s32 7, %v2048_v1  ;;  %s1582_s19 = sshll.u32 %s1903_s13, 7  ;;  %s1462_s30 = scalar_lea.sflag [#allocation4], %s2030_s5 }
  0x5d   : > { %v215_v5 = vrot.slane %v197_v4, %v214_v2  ;;  %v204_v6 = vrot.slane %v197_v4, %v203_v3  ;;  %v226_v8 = vrot.slane %v197_v4, %v225_v7  ;;  %v308_v10 = vrot.slane %v196_v9, %v203_v3  ;;  %s2991_s8 = scalar_lea.hbm %s3037_s2, %s1582_s19  ;;  %s1785_s3 = scalar_lea.vmem %s2993_s17, 128 }
  0x5e   : > { %v319_v11 = vrot.slane %v196_v9, %v214_v2  ;;  %v237_v13 = vrot.slane %v197_v4, %v236_v12  ;;  %v330_v14 = vrot.slane %v196_v9, %v225_v7  ;;  %v248_v16 = vrot.slane %v197_v4, %v247_v15  ;;  %p1786_p13 = scmp.ne.s32.totalorder %s2993_s17, %s1785_s3  ;;  %p3092_p3 = scmp.ne.s32.totalorder %s3053_s21, 0 }
  0x5f   : > { %217 = vbcast.lane.b32.xlu1 %v215_v5, 256  ;;  %206 = vbcast.lane.b32.xlu0 %v204_v6, 256  ;;  %v341_v17 = vrot.slane %v196_v9, %v236_v12  ;;  %v259_v19 = vrot.slane %v197_v4, %v258_v18  ;;  %v352_v20 = vrot.slane %v196_v9, %v247_v15  ;;  %v2063_v46 = vadd.s32 1, %v2060_v43  ;;  %s1866_s13 = smov [#allocation7]  }
  0x60   : > { %v270_v22 = vrot.slane %v197_v4, %v269_v21  ;;  %v363_v23 = vrot.slane %v196_v9, %v258_v18  ;;  %v281_v25 = vrot.slane %v197_v4, %v280_v24  ;;  %v374_v26 = vrot.slane %v196_v9, %v269_v21  ;;  %p1787_p7 = pnand %p1786_p13, %p3092_p3  ;;  %s1789_s6 = sshll.u32 %s1866_s13, 4  ;;  %s1790_s6 = int_to_ptr.vmem [resolvable:$false] %s1789_s6 }
  0x61   : > { %v385_v27 = vrot.slane %v196_v9, %v280_v24  ;;  %s1791_s29 = scalar_lea.vmem %s1790_s6, 256  ;;  %p1792_p8 = scmp.lt.s32.totalorder %s2993_s17, %s1790_s6 }
  0x62   : > { %p1788_p5 = pneg %p1787_p7  ;;  %p1793_p9 = scmp.lt.s32.totalorder %s1791_s29, %s1785_s3 }
  0x63   : > { %221 = vbcast.lane.b32.xlu1 %v215_v5, 264  ;;  %210 = vbcast.lane.b32.xlu0 %v204_v6, 264 }
  0x64   : > { %p1794_p0 = por %p1793_p9, %p1792_p8 }
  0x66   : > { %p1795_p1 = pnand %p1794_p0, %p1788_p5 }
  0x67   : > { %232 = vbcast.lane.b32.xlu1 %v226_v8, 264  ;;  %228 = vbcast.lane.b32.xlu0 %v226_v8, 256 }
  0x6b   : > { %314 = vbcast.lane.b32.xlu1 %v308_v10, 264  ;;  %310 = vbcast.lane.b32.xlu0 %v308_v10, 256 }
  0x6f   : > { %325 = vbcast.lane.b32.xlu1 %v319_v11, 264  ;;  %321 = vbcast.lane.b32.xlu0 %v319_v11, 256 }
  0x73   : > { %243 = vbcast.lane.b32.xlu1 %v237_v13, 264  ;;  %239 = vbcast.lane.b32.xlu0 %v237_v13, 256 }
  0x77   : > { %336 = vbcast.lane.b32.xlu1 %v330_v14, 264  ;;  %332 = vbcast.lane.b32.xlu0 %v330_v14, 256 }
  0x7b   : > { %254 = vbcast.lane.b32.xlu1 %v248_v16, 264  ;;  %250 = vbcast.lane.b32.xlu0 %v248_v16, 256 }
  0x7f   : > { %347 = vbcast.lane.b32.xlu1 %v341_v17, 264  ;;  %343 = vbcast.lane.b32.xlu0 %v341_v17, 256 }
  0x83   : > { %265 = vbcast.lane.b32.xlu1 %v259_v19, 264  ;;  %261 = vbcast.lane.b32.xlu0 %v259_v19, 256 }
  0x87   : > { %358 = vbcast.lane.b32.xlu1 %v352_v20, 264  ;;  %354 = vbcast.lane.b32.xlu0 %v352_v20, 256 }
  0x8b   : > { %276 = vbcast.lane.b32.xlu1 %v270_v22, 264  ;;  %272 = vbcast.lane.b32.xlu0 %v270_v22, 256 }
  0x8f   : > { %369 = vbcast.lane.b32.xlu1 %v363_v23, 264  ;;  %365 = vbcast.lane.b32.xlu0 %v363_v23, 256 }
  0x93   : > { %287 = vbcast.lane.b32.xlu1 %v281_v25, 264  ;;  %283 = vbcast.lane.b32.xlu0 %v281_v25, 256 }
  0x97   : > { %380 = vbcast.lane.b32.xlu1 %v374_v26, 264  ;;  %376 = vbcast.lane.b32.xlu0 %v374_v26, 256 }
  0x9b   : > { %391 = vbcast.lane.b32.xlu1 %v385_v27, 264  ;;  %387 = vbcast.lane.b32.xlu0 %v385_v27, 256 }
  0x9f   : > { %518 = vrot.lane.b32.xlu1 %v1859_v28, %s1860_s20 }
  0xd1   : > { %v218_v29 = vpop.permute.xlu1 %217  ;;  %v207_v30 = vpop.permute.xlu0 %206 }
  0xd2   : > { %vm291_vm0 = vcmp.eq.s32.totalorder %v218_v29, %v2063_v46  ;;  %vm289_vm3 = vcmp.eq.s32.totalorder %v207_v30, %v2063_v46 }
  0xd5   : > { %v222_v31 = vpop.permute.xlu1 %221  ;;  %v211_v32 = vpop.permute.xlu0 %210 }
  0xd6   : > { %vm292_vm1 = vcmp.eq.s32.totalorder %v222_v31, %v2063_v46  ;;  %vm290_vm4 = vcmp.eq.s32.totalorder %v211_v32, %v2063_v46 }
  0xd9   : > { %v233_v33 = vpop.permute.xlu1 %232  ;;  %v229_v34 = vpop.permute.xlu0 %228 }
  0xda   : > { %vm294_vm5 = vcmp.eq.s32.totalorder %v233_v33, %v2063_v46  ;;  %vm293_vm6 = vcmp.eq.s32.totalorder %v229_v34, %v2063_v46 }
  0xdd   : > { %v315_v35 = vpop.permute.xlu1 %314  ;;  %v311_v36 = vpop.permute.xlu0 %310 }
  0xde   : > { %v394_v53 = vsel %vm290_vm4, %v315_v35, 0.0  ;;  %v393_v54 = vsel %vm289_vm3, %v311_v36, 0.0  ;;  %vm491_vm3 = vcmask 1041409   ;;  %vm493_vm4 = vcmask 1042434  }
  0xdf   : > { %v411_v61 = vsel %vm3040_vm2, %v394_v53, 0.0  ;;  %v410_v62 = vsel %vm3040_vm2, %v393_v54, 0.0 }
  0xe0   : > { %v412_v11 = vadd.f32 %v411_v61, %v410_v62 }
  0xe1   : > { %v326_v37 = vpop.permute.xlu1 %325  ;;  %v322_v38 = vpop.permute.xlu0 %321 }
  0xe2   : > { %v396_v49 = vsel %vm292_vm1, %v326_v37, 0.0  ;;  %v395_v50 = vsel %vm291_vm0, %v322_v38, 0.0  ;;  %v413_v18 = vrot.slane %v412_v11, 4  ;;  %vm3041_vm1 = vcmask 1047680  }
  0xe3   : > { %v420_v57 = vsel %vm3040_vm2, %v396_v49, 0.0  ;;  %v419_v58 = vsel %vm3040_vm2, %v395_v50, 0.0 }
  0xe4   : > { %v421_v6 = vadd.f32 %v420_v57, %v419_v58  ;;  %v414_v30 = vadd.f32 %v413_v18, %v412_v11 }
  0xe5   : > { %v244_v39 = vpop.permute.xlu1 %243  ;;  %v240_v40 = vpop.permute.xlu0 %239 }
  0xe6   : > { %vm296_vm7 = vcmp.eq.s32.totalorder %v244_v39, %v2063_v46  ;;  %vm295_vm8 = vcmp.eq.s32.totalorder %v240_v40, %v2063_v46  ;;  %v422_v16 = vrot.slane %v421_v6, 4  ;;  %v415_v39 = vrot.slane %v414_v30, 2 }
  0xe8   : > { %v423_v25 = vadd.f32 %v422_v16, %v421_v6  ;;  %v416_v54 = vadd.f32 %v415_v39, %v414_v30 }
  0xe9   : > { %v337_v41 = vpop.permute.xlu1 %336  ;;  %v333_v42 = vpop.permute.xlu0 %332 }
  0xea   : > { %v398_v55 = vsel %vm294_vm5, %v337_v41, 0.0  ;;  %v397_v56 = vsel %vm293_vm6, %v333_v42, 0.0  ;;  %v424_v36 = vrot.slane %v423_v25, 2  ;;  %vm495_vm5 = vcmask 1043459  }
  0xeb   : > { %v429_v2 = vsel %vm3040_vm2, %v398_v55, 0.0  ;;  %v428_v3 = vsel %vm3040_vm2, %v397_v56, 0.0  ;;  %vm497_vm6 = vcmask 1044484  }
  0xec   : > { %v430_v12 = vadd.f32 %v429_v2, %v428_v3 }
  0xed   : > { %v255_v44 = vpop.permute.xlu1 %254  ;;  %v251_v45 = vpop.permute.xlu0 %250 }
  0xee   : > { %vm298_vm9 = vcmp.eq.s32.totalorder %v255_v44, %v2063_v46  ;;  %vm297_vm10 = vcmp.eq.s32.totalorder %v251_v45, %v2063_v46  ;;  %v431_v19 = vrot.slane %v430_v12, 4 }
  0xf0   : > { %v432_v31 = vadd.f32 %v431_v19, %v430_v12 }
  0xf1   : > { %v348_v47 = vpop.permute.xlu1 %347  ;;  %v344_v48 = vpop.permute.xlu0 %343 }
  0xf2   : > { %v400_v59 = vsel %vm296_vm7, %v348_v47, 0.0  ;;  %v399_v60 = vsel %vm295_vm8, %v344_v48, 0.0  ;;  %v433_v40 = vrot.slane %v432_v31, 2  ;;  %v425_v48 = vadd.f32 %v424_v36, %v423_v25 }
  0xf3   : > { %v438_v7 = vsel %vm3040_vm2, %v400_v59, 0.0  ;;  %v437_v8 = vsel %vm3040_vm2, %v399_v60, 0.0  ;;  %vm499_vm7 = vcmask 1045509   ;;  %vm501_vm8 = vcmask 1046534  }
  0xf4   : > { %v439_v15 = vadd.f32 %v438_v7, %v437_v8  ;;  %v434_v55 = vadd.f32 %v433_v40, %v432_v31  ;;  %v426_v62 = vrot.slane %v425_v48, 1  ;;  %v417_v7 = vrot.slane %v416_v54, 1 }
  0xf5   : > { %v266_v51 = vpop.permute.xlu1 %265  ;;  %v262_v52 = vpop.permute.xlu0 %261 }
  0xf6   : > { %vm300_vm11 = vcmp.eq.s32.totalorder %v266_v51, %v2063_v46  ;;  %vm299_vm12 = vcmp.eq.s32.totalorder %v262_v52, %v2063_v46  ;;  %v440_v22 = vrot.slane %v439_v15, 4  ;;  %v435_v6 = vrot.slane %v434_v55, 1 }
  0xf7   : > { %v2103_v18 = vadd.f32 %v417_v7, %v416_v54 }
  0xf8   : > { %v441_v34 = vadd.f32 %v440_v22, %v439_v15 }
  0xf9   : > { %v359_v63 = vpop.permute.xlu1 %358  ;;  %v355_v0 = vpop.permute.xlu0 %354  ;;  %3064 = vst [vmem:[#allocation14_spill] sm:$0xff] %v2103_v18 }
  0xfa   : > { %v402_v4 = vsel %vm298_vm9, %v359_v63, 0.0  ;;  %v401_v5 = vsel %vm297_vm10, %v355_v0, 0.0  ;;  %v442_v44 = vrot.slane %v441_v34, 2  ;;  %vm503_vm9 = vcmask 1047559  }
  0xfb   : > { %v447_v9 = vsel %vm3040_vm2, %v402_v4, 0.0  ;;  %v446_v10 = vsel %vm3040_vm2, %v401_v5, 0.0  ;;  %vm482_vm10 = vcmp.ge.s32.totalorder %v2060_v43, 15 }
  0xfc   : > { %v448_v17 = vadd.f32 %v447_v9, %v446_v10  ;;  %v443_v58 = vadd.f32 %v442_v44, %v441_v34  ;;  %v2097_v10 = vadd.f32 %v426_v62, %v425_v48 }
  0xfd   : > { %v277_v13 = vpop.permute.xlu1 %276  ;;  %v273_v14 = vpop.permute.xlu0 %272 }
  0xfe   : > { %v449_v26 = vrot.slane %v448_v17, 4  ;;  %vm302_vm13 = vcmp.eq.s32.totalorder %v277_v13, %v2063_v46  ;;  %vm301_vm14 = vcmp.eq.s32.totalorder %v273_v14, %v2063_v46  ;;  %v444_v8 = vrot.slane %v443_v58, 1  ;;  %3062 = vst [vmem:[#allocation12_spill] sm:$0xff] %v2097_v10 }
  0xff   : > { %v492_v25 = vsel %vm491_vm3, %v2097_v10, %v2103_v18 }
 0x100   : > { %v450_v37 = vadd.f32 %v449_v26, %v448_v17  ;;  %v2100_v17 = vadd.f32 %v435_v6, %v434_v55  ;;  %v2105_v19 = vadd.f32 %v444_v8, %v443_v58 }
 0x101   : > { %v370_v20 = vpop.permute.xlu1 %369  ;;  %v366_v21 = vpop.permute.xlu0 %365 }
 0x102   : > { %v404_v23 = vsel %vm300_vm11, %v370_v20, 0.0  ;;  %v403_v24 = vsel %vm299_vm12, %v366_v21, 0.0  ;;  %v451_v49 = vrot.slane %v450_v37, 2  ;;  %3063 = vst [vmem:[#allocation13_spill] sm:$0xff] %v2100_v17  ;;  %3065 = vst [vmem:[#allocation15_spill] sm:$0xff] %v2105_v19 }
 0x103   : > { %v456_v27 = vsel %vm3040_vm2, %v404_v23, 0.0  ;;  %v455_v28 = vsel %vm3040_vm2, %v403_v24, 0.0 }
 0x104   : > { %v457_v29 = vadd.f32 %v456_v27, %v455_v28  ;;  %v452_v63 = vadd.f32 %v451_v49, %v450_v37  ;;  %v494_v27 = vsel %vm493_vm4, %v2100_v17, %v492_v25 }
 0x105   : > { %v288_v32 = vpop.permute.xlu1 %287  ;;  %v284_v33 = vpop.permute.xlu0 %283 }
 0x106   : > { %v458_v35 = vrot.slane %v457_v29, 4  ;;  %vm304_vm15 = vcmp.eq.s32.totalorder %v288_v32, %v2063_v46  ;;  %vm303_vm0 = vcmp.eq.s32.totalorder %v284_v33, %v2063_v46  ;;  %v453_v11 = vrot.slane %v452_v63, 1 }
 0x108   : > { %v459_v38 = vadd.f32 %v458_v35, %v457_v29  ;;  %v2107_v22 = vadd.f32 %v453_v11, %v452_v63  ;;  %v496_v29 = vsel %vm495_vm5, %v2105_v19, %v494_v27 }
 0x109   : > { %v381_v41 = vpop.permute.xlu1 %380  ;;  %v377_v42 = vpop.permute.xlu0 %376 }
 0x10a   : > { %v406_v45 = vsel %vm302_vm13, %v381_v41, 0.0  ;;  %v405_v47 = vsel %vm301_vm14, %v377_v42, 0.0  ;;  %v460_v52 = vrot.slane %v459_v38, 2  ;;  %3066 = vst [vmem:[#allocation16_spill] sm:$0xff] %v2107_v22  ;;  %v498_v30 = vsel %vm497_vm6, %v2107_v22, %v496_v29 }
 0x10b   : > { %v465_v50 = vsel %vm3040_vm2, %v406_v45, 0.0  ;;  %v464_v51 = vsel %vm3040_vm2, %v405_v47, 0.0 }
 0x10c   : > { %v466_v53 = vadd.f32 %v465_v50, %v464_v51  ;;  %v461_v3 = vadd.f32 %v460_v52, %v459_v38 }
 0x10d   : > { %v392_v56 = vpop.permute.xlu1 %391  ;;  %v388_v57 = vpop.permute.xlu0 %387 }
 0x10e   : > { %v467_v59 = vrot.slane %v466_v53, 4  ;;  %v408_v60 = vsel %vm304_vm15, %v392_v56, 0.0  ;;  %v407_v61 = vsel %vm303_vm0, %v388_v57, 0.0  ;;  %v462_v13 = vrot.slane %v461_v3, 1 }
 0x10f   : > { %v474_v0 = vsel %vm3040_vm2, %v408_v60, 0.0  ;;  %v473_v2 = vsel %vm3040_vm2, %v407_v61, 0.0 }
 0x110   : > { %v468_v4 = vadd.f32 %v467_v59, %v466_v53  ;;  %v475_v5 = vadd.f32 %v474_v0, %v473_v2  ;;  %v2109_v23 = vadd.f32 %v462_v13, %v461_v3 }
 0x111   : > { %v519_v12 = vpop.permute.xlu1 %518 }
 0x112   : > { %v469_v9 = vrot.slane %v468_v4, 2  ;;  %v476_v46 = vrot.slane %v475_v5, 4  ;;  %v520_v16 = vsel %vm3041_vm1, %v519_v12, 1.0  ;;  %3067 = vst [vmem:[#allocation17_spill] sm:$0xff] %v2109_v23  ;;  %v500_v32 = vsel %vm499_vm7, %v2109_v23, %v498_v30 }
 0x113   : > { %521 = vrot.lane.b32.xlu1 %v520_v16, %s1860_s20 }
 0x114   : > { %v470_v14 = vadd.f32 %v469_v9, %v468_v4  ;;  %v477_v15 = vadd.f32 %v476_v46, %v475_v5 }
 0x116   : > { %v471_v20 = vrot.slane %v470_v14, 1  ;;  %v478_v21 = vrot.slane %v477_v15, 2 }
 0x118   : > { %v479_v24 = vadd.f32 %v478_v21, %v477_v15  ;;  %v2114_v26 = vadd.f32 %v471_v20, %v470_v14 }
 0x11a   : > { %3068 = vst [vmem:[#allocation18_spill] sm:$0xff] %v2114_v26  ;;  %v480_v28 = vrot.slane %v479_v24, 1  ;;  %v502_v33 = vsel %vm501_vm8, %v2114_v26, %v500_v32 }
 0x11c   : > { %v2122_v31 = vadd.f32 %v480_v28, %v479_v24 }
 0x11e   : > { %3069 = vst [vmem:[#allocation19_spill] sm:$0xff] %v2122_v31  ;;  %v504_v34 = vsel %vm503_vm9, %v2122_v31, %v502_v33 }
 0x11f   : > { %507 = vrot.lane.b32.xlu0 %v504_v34, %s1860_s20 }
 0x185   : > { %v522_v35 = vpop.permute.xlu1 %521 }
 0x186   : > { %v523_v36 = vsel %vm3041_vm1, %v522_v35, 1.0 }
 0x187   : > { %525 = vrot.lane.b32.xlu1 %v523_v36, %s1861_s7 }
 0x191   : > { %v508_v37 = vpop.permute.xlu0 %507 }
 0x192   : > { %v509_v38 = vsel %vm3041_vm1, %v508_v37, %v504_v34 }
 0x193   : > { %510 = vrot.lane.b32.xlu0 %v509_v38, %s1860_s20 }
 0x205   : > { %v511_v39 = vpop.permute.xlu0 %510 }
 0x206   : > { %v512_v40 = vsel %vm3041_vm1, %v511_v39, %v504_v34 }
 0x207   : > { %514 = vrot.lane.b32.xlu0 %v512_v40, %s1861_s7 }
 0x279   : > { %v515_v41 = vpop.permute.xlu0 %514 }
 0x27a   : > { %v2138_v42 = vsel %vm482_vm10, -inf, %v515_v41 }
 0x27b   : > { %v2141_v44 = vrot.slane %v2138_v42, 1  ;;  %v2144_v45 = vrot.slane %v2138_v42, 2  ;;  %v553_v47 = vsub.f32 %v2103_v18, %v2138_v42  ;;  %v2149_v48 = vrot.slane %v2138_v42, 3 }
 0x27c   : > { %v2152_v49 = vrot.slane %v2138_v42, 4  ;;  %v2159_v53 = vrot.slane %v2138_v42, 5  ;;  %v2162_v54 = vrot.slane %v2138_v42, 6  ;;  %v2165_v55 = vrot.slane %v2138_v42, 7 }
 0x27d   : > { %v554_v50 = vsub.f32 %v2097_v10, %v2141_v44  ;;  %v555_v51 = vsub.f32 %v2100_v17, %v2144_v45  ;;  %v561_v52 = vand.u32 2147483647, %v553_v47  ;;  %vm545_vm11 = vcmp.ge.f32.partialorder %v2103_v18, %v2138_v42 }
 0x27e   : > { %vm546_vm12 = vcmp.ge.f32.partialorder %v2097_v10, %v2141_v44  ;;  %vm547_vm13 = vcmp.ge.f32.partialorder %v2100_v17, %v2144_v45  ;;  %v556_v59 = vsub.f32 %v2105_v19, %v2149_v48  ;;  %v557_v60 = vsub.f32 %v2107_v22, %v2152_v49 }
 0x27f   : > { %v562_v56 = vand.u32 2147483647, %v554_v50  ;;  %v563_v57 = vand.u32 2147483647, %v555_v51  ;;  %v569_v58 = vsub.f32 0.0, %v561_v52  ;;  %v558_v0 = vsub.f32 %v2109_v23, %v2159_v53 }
 0x280   : > { %v559_v2 = vsub.f32 %v2114_v26, %v2162_v54  ;;  %v560_v3 = vsub.f32 %v2122_v31, %v2165_v55  ;;  %v564_v4 = vand.u32 2147483647, %v556_v59  ;;  %v565_v5 = vand.u32 2147483647, %v557_v60 }
 0x281   : > { %v570_v61 = vsub.f32 0.0, %v562_v56  ;;  %v571_v62 = vsub.f32 0.0, %v563_v57  ;;  %v577_v63 = vmul.f32 1.442695, %v569_v58  ;;  %v566_v8 = vand.u32 2147483647, %v558_v0 }
 0x282   : > { %v567_v9 = vand.u32 2147483647, %v559_v2  ;;  %v568_v46 = vand.u32 2147483647, %v560_v3  ;;  %v572_v11 = vsub.f32 0.0, %v564_v4  ;;  %v573_v12 = vsub.f32 0.0, %v565_v5  ;;  %v526_v5 = vpop.permute.xlu1 %525 }
 0x283   : > { %1645 = vpow2.f32 %v577_v63  ;;  %v579_v6 = vmul.f32 1.442695, %v570_v61  ;;  %v581_v7 = vmul.f32 1.442695, %v571_v62  ;;  %vm548_vm14 = vcmp.ge.f32.partialorder %v2105_v19, %v2149_v48 }
 0x284   : > { %vm549_vm15 = vcmp.ge.f32.partialorder %v2107_v22, %v2152_v49  ;;  %v574_v13 = vsub.f32 0.0, %v566_v8  ;;  %v575_v14 = vsub.f32 0.0, %v567_v9  ;;  %v576_v15 = vsub.f32 0.0, %v568_v46 }
 0x285   : > { %1647 = vpow2.f32 %v579_v6  ;;  %v583_v16 = vmul.f32 1.442695, %v572_v11  ;;  %v585_v20 = vmul.f32 1.442695, %v573_v12  ;;  %v2192_v24 = vsel %vm546_vm12, %v2097_v10, %v2141_v44 }
 0x286   : > { %1649 = vpow2.f32 %v581_v7  ;;  %v587_v21 = vmul.f32 1.442695, %v574_v13  ;;  %v2199_v25 = vsel %vm547_vm13, %v2100_v17, %v2144_v45  ;;  %vm550_vm0 = vcmp.ge.f32.partialorder %v2109_v23, %v2159_v53 }
 0x287   : > { %1651 = vpow2.f32 %v583_v16  ;;  %v589_v27 = vmul.f32 1.442695, %v575_v14  ;;  %v591_v28 = vmul.f32 1.442695, %v576_v15  ;;  %vm551_vm2 = vcmp.ge.f32.partialorder %v2114_v26, %v2162_v54 }
 0x288   : > { %vm552_vm1 = vcmp.ge.f32.partialorder %v2122_v31, %v2165_v55  ;;  %1653 = vpow2.f32 %v585_v20  ;;  %v2212_v29 = vsel %vm548_vm14, %v2105_v19, %v2149_v48  ;;  %v2219_v30 = vsel %vm549_vm15, %v2107_v22, %v2152_v49 }
 0x289   : > { %1655 = vpow2.f32 %v587_v21  ;;  %v683_v32 = vrot.slane %v2192_v24, 7  ;;  %v685_v33 = vrot.slane %v2199_v25, 6  ;;  %v2228_v34 = vsel %vm545_vm11, %v2103_v18, %v2138_v42 }
 0x28a   : > { %1657 = vpow2.f32 %v589_v27  ;;  %v2235_v35 = vsel %vm550_vm0, %v2109_v23, %v2159_v53  ;;  %v2242_v36 = vsel %vm551_vm2, %v2114_v26, %v2162_v54  ;;  %v687_v38 = vrot.slane %v2212_v29, 5 }
 0x28b   : > { %1659 = vpow2.f32 %v591_v28  ;;  %v684_v37 = vsel %vm491_vm3, %v683_v32, %v2228_v34  ;;  %v2252_v40 = vsel %vm552_vm1, %v2122_v31, %v2165_v55  ;;  %v689_v47 = vrot.slane %v2219_v30, 4 }
 0x28c   : > { %v686_v41 = vsel %vm493_vm4, %v685_v33, %v684_v37  ;;  %v691_v51 = vrot.slane %v2235_v35, 3  ;;  %v693_v57 = vrot.slane %v2242_v36, 2  ;;  %v695_v60 = vrot.slane %v2252_v40, 1 }
 0x28d   : > { %v1646_v39 = vpop.eup %1645  ;;  %v688_v50 = vsel %vm495_vm5, %v687_v38, %v686_v41  ;;  %v528_v14 = vsel %vm482_vm10, 0.0, %v526_v5 }
 0x28e   : > { %v690_v56 = vsel %vm497_vm6, %v689_v47, %v688_v50  ;;  %v619_v32 = vrot.slane %v528_v14, 1  ;;  %v620_v33 = vrot.slane %v528_v14, 2  ;;  %v621_v37 = vrot.slane %v528_v14, 3 }
 0x28f   : > { %v1648_v52 = vpop.eup %1647  ;;  %v692_v59 = vsel %vm499_vm7, %v691_v51, %v690_v56  ;;  %v622_v41 = vrot.slane %v528_v14, 4  ;;  %v623_v47 = vrot.slane %v528_v14, 5  ;;  %v624_v51 = vrot.slane %v528_v14, 6 }
 0x290   : > { %v1650_v58 = vpop.eup %1649  ;;  %v601_v61 = vrot.slane %v1648_v52, 7  ;;  %v694_v62 = vsel %vm501_vm8, %v693_v57, %v692_v59  ;;  %v625_v56 = vrot.slane %v528_v14, 7  ;;  %v634_v57 = vadd.f32 %v1646_v39, %v528_v14 }
 0x291   : > { %v603_v63 = vrot.slane %v1650_v58, 6  ;;  %v1652_v0 = vpop.eup %1651  ;;  %v2264_v2 = vsel %vm503_vm9, %v695_v60, %v694_v62  ;;  %v635_v59 = vadd.f32 %v1648_v52, %v619_v32  ;;  %v636_v60 = vadd.f32 %v1650_v58, %v620_v33 }
 0x292   : > { %v602_v3 = vsel %vm491_vm3, %v601_v61, %v1646_v39  ;;  %v1654_v4 = vpop.eup %1653  ;;  %698 = vrot.lane.b32.xlu0 %v2264_v2, %s1860_s20  ;;  %v605_v7 = vrot.slane %v1652_v0, 5  ;;  %v637_v61 = vadd.f32 %v1652_v0, %v621_v37 }
 0x293   : > { %v604_v6 = vsel %vm493_vm4, %v603_v63, %v602_v3  ;;  %v1656_v8 = vpop.eup %1655  ;;  %v607_v9 = vrot.slane %v1654_v4, 4 }
 0x294   : > { %v1658_v46 = vpop.eup %1657  ;;  %v606_v11 = vsel %vm495_vm5, %v605_v7, %v604_v6  ;;  %v609_v12 = vrot.slane %v1656_v8, 3  ;;  %v638_v6 = vadd.f32 %v1654_v4, %v622_v41  ;;  %v639_v7 = vadd.f32 %v1656_v8, %v623_v47 }
 0x295   : > { %v1660_v13 = vpop.eup %1659  ;;  %v608_v15 = vsel %vm497_vm6, %v607_v9, %v606_v11  ;;  %v611_v16 = vrot.slane %v1658_v46, 2  ;;  %v640_v58 = vadd.f32 %v1658_v46, %v624_v51 }
 0x296   : > { %v610_v20 = vsel %vm499_vm7, %v609_v12, %v608_v15  ;;  %v613_v21 = vrot.slane %v1660_v13, 1  ;;  %v641_v4 = vadd.f32 %v1660_v13, %v625_v56 }
 0x297   : > { %v612_v27 = vsel %vm501_vm8, %v611_v16, %v610_v20 }
 0x298   : > { %v614_v28 = vsel %vm503_vm9, %v613_v21, %v612_v27 }
 0x299   : > { %v616_v38 = vmul.f32 %v614_v28, %v528_v14 }
 0x29b   : > { %v617_v50 = vadd.f32 1.0, %v616_v38 }
 0x29d   : > { %v643_v62 = vrot.slane %v617_v50, 1  ;;  %v644_v63 = vrot.slane %v617_v50, 2  ;;  %v645_v3 = vrot.slane %v617_v50, 3  ;;  %v646_v5 = vrot.slane %v617_v50, 4 }
 0x29e   : > { %v647_v9 = vrot.slane %v617_v50, 5  ;;  %v648_v11 = vrot.slane %v617_v50, 6  ;;  %v649_v12 = vrot.slane %v617_v50, 7  ;;  %v2301_v45 = vsel %vm545_vm11, %v617_v50, %v634_v57 }
 0x29f   : > { %v2280_v15 = vsel %vm546_vm12, %v643_v62, %v635_v59  ;;  %v2285_v39 = vsel %vm547_vm13, %v644_v63, %v636_v60  ;;  %v2290_v52 = vsel %vm548_vm14, %v645_v3, %v637_v61  ;;  %v2295_v0 = vsel %vm549_vm15, %v646_v5, %v638_v6 }
 0x2a0   : > { %v717_v44 = vrot.slane %v2280_v15, 7  ;;  %v2306_v48 = vsel %vm550_vm0, %v647_v9, %v639_v7  ;;  %v719_v8 = vrot.slane %v2285_v39, 6  ;;  %v2312_v49 = vsel %vm551_vm2, %v648_v11, %v640_v58 }
 0x2a1   : > { %v721_v13 = vrot.slane %v2290_v52, 5  ;;  %v2320_v42 = vsel %vm552_vm1, %v649_v12, %v641_v4  ;;  %v723_v14 = vrot.slane %v2295_v0, 4  ;;  %v725_v54 = vrot.slane %v2306_v48, 3 }
 0x2a2   : > { %v718_v46 = vsel %vm491_vm3, %v717_v44, %v2301_v45  ;;  %v727_v21 = vrot.slane %v2312_v49, 2  ;;  %v729_v28 = vrot.slane %v2320_v42, 1  ;;  %vm3070_vm2 = vcmask 1047680  }
 0x2a3   : > { %v720_v53 = vsel %vm493_vm4, %v719_v8, %v718_v46  ;;  %vm3071_vm1 = vmmov %vm3070_vm2  ;;  %vm674_vm12 = vcmp.ge.s32.totalorder %v2060_v43, 14 }
 0x2a4   : > { %v722_v16 = vsel %vm495_vm5, %v721_v13, %v720_v53  ;;  %vm3072_vm10 = vmmov %vm3071_vm1 }
 0x2a5   : > { %v724_v20 = vsel %vm497_vm6, %v723_v14, %v722_v16  ;;  %vm3073_vm11 = vmmov %vm3071_vm1 }
 0x2a6   : > { %v726_v27 = vsel %vm499_vm7, %v725_v54, %v724_v20 }
 0x2a7   : > { %v728_v55 = vsel %vm501_vm8, %v727_v21, %v726_v27 }
 0x2a8   : > { %v730_v32 = vsel %vm503_vm9, %v729_v28, %v728_v55 }
 0x2a9   : > { %732 = vrot.lane.b32.xlu1 %v730_v32, %s1860_s20 }
 0x304   : > { %v699_v33 = vpop.permute.xlu0 %698 }
 0x305   : > { %v700_v37 = vsel %vm3070_vm2, %v699_v33, %v2264_v2 }
 0x306   : > { %701 = vrot.lane.b32.xlu0 %v700_v37, %s1860_s20 }
 0x31b   : > { %v733_v38 = vpop.permute.xlu1 %732 }
 0x31c   : > { %v734_v41 = vsel %vm3071_vm1, %v733_v38, %v730_v32 }
 0x31d   : > { %735 = vrot.lane.b32.xlu1 %v734_v41, %s1860_s20 }
 0x378   : > { %v702_v47 = vpop.permute.xlu0 %701 }
 0x379   : > { %v703_v50 = vsel %vm3072_vm10, %v702_v47, %v2264_v2 }
 0x37a   : > { %705 = vrot.lane.b32.xlu0 %v703_v50, %s1862_s14 }
 0x38f   : > { %v736_v51 = vpop.permute.xlu1 %735 }
 0x390   : > { %v737_v56 = vsel %vm3073_vm11, %v736_v51, %v730_v32 }
 0x391   : > { %739 = vrot.lane.b32.xlu1 %v737_v56, %s1862_s14 }
 0x3ec   : > { %v706_v57 = vpop.permute.xlu0 %705 }
 0x3ed   : > { %v2344_v59 = vsel %vm674_vm12, -inf, %v706_v57 }
 0x3ee   : > { %v2347_v60 = vrot.slane %v2344_v59, 1  ;;  %v2350_v61 = vrot.slane %v2344_v59, 2  ;;  %v767_v2 = vsub.f32 %v2228_v34, %v2344_v59  ;;  %v2355_v62 = vrot.slane %v2344_v59, 3 }
 0x3ef   : > { %v2358_v63 = vrot.slane %v2344_v59, 4  ;;  %v2365_v7 = vrot.slane %v2344_v59, 5  ;;  %v2368_v9 = vrot.slane %v2344_v59, 6  ;;  %v2371_v11 = vrot.slane %v2344_v59, 7 }
 0x3f0   : > { %v768_v3 = vsub.f32 %v2192_v24, %v2347_v60  ;;  %v769_v5 = vsub.f32 %v2199_v25, %v2350_v61  ;;  %v775_v6 = vand.u32 2147483647, %v767_v2  ;;  %vm759_vm13 = vcmp.ge.f32.partialorder %v2228_v34, %v2344_v59 }
 0x3f1   : > { %vm760_vm14 = vcmp.ge.f32.partialorder %v2192_v24, %v2347_v60  ;;  %vm761_vm15 = vcmp.ge.f32.partialorder %v2199_v25, %v2350_v61  ;;  %v770_v4 = vsub.f32 %v2212_v29, %v2355_v62  ;;  %v771_v8 = vsub.f32 %v2219_v30, %v2358_v63 }
 0x3f2   : > { %v776_v12 = vand.u32 2147483647, %v768_v3  ;;  %v777_v58 = vand.u32 2147483647, %v769_v5  ;;  %v783_v44 = vsub.f32 0.0, %v775_v6  ;;  %v772_v14 = vsub.f32 %v2235_v35, %v2365_v7 }
 0x3f3   : > { %v773_v16 = vsub.f32 %v2242_v36, %v2368_v9  ;;  %v774_v54 = vsub.f32 %v2252_v40, %v2371_v11  ;;  %v778_v20 = vand.u32 2147483647, %v770_v4  ;;  %v779_v21 = vand.u32 2147483647, %v771_v8 }
 0x3f4   : > { %v784_v46 = vsub.f32 0.0, %v776_v12  ;;  %v785_v13 = vsub.f32 0.0, %v777_v58  ;;  %v791_v53 = vmul.f32 1.442695, %v783_v44  ;;  %v780_v55 = vand.u32 2147483647, %v772_v14 }
 0x3f5   : > { %v781_v32 = vand.u32 2147483647, %v773_v16  ;;  %v782_v33 = vand.u32 2147483647, %v774_v54  ;;  %v786_v37 = vsub.f32 0.0, %v778_v20  ;;  %v787_v38 = vsub.f32 0.0, %v779_v21 }
 0x3f6   : > { %1661 = vpow2.f32 %v791_v53  ;;  %v793_v27 = vmul.f32 1.442695, %v784_v46  ;;  %v795_v28 = vmul.f32 1.442695, %v785_v13  ;;  %vm762_vm0 = vcmp.ge.f32.partialorder %v2212_v29, %v2355_v62 }
 0x3f7   : > { %vm763_vm2 = vcmp.ge.f32.partialorder %v2219_v30, %v2358_v63  ;;  %v788_v41 = vsub.f32 0.0, %v780_v55  ;;  %v789_v47 = vsub.f32 0.0, %v781_v32  ;;  %v790_v50 = vsub.f32 0.0, %v782_v33 }
 0x3f8   : > { %1663 = vpow2.f32 %v793_v27  ;;  %v797_v51 = vmul.f32 1.442695, %v786_v37  ;;  %v799_v56 = vmul.f32 1.442695, %v787_v38  ;;  %v2398_v2 = vsel %vm760_vm14, %v2192_v24, %v2347_v60 }
 0x3f9   : > { %1665 = vpow2.f32 %v795_v28  ;;  %v801_v57 = vmul.f32 1.442695, %v788_v41  ;;  %v2405_v3 = vsel %vm761_vm15, %v2199_v25, %v2350_v61  ;;  %vm764_vm1 = vcmp.ge.f32.partialorder %v2235_v35, %v2365_v7 }
 0x3fa   : > { %1667 = vpow2.f32 %v797_v51  ;;  %v803_v5 = vmul.f32 1.442695, %v789_v47  ;;  %v805_v6 = vmul.f32 1.442695, %v790_v50  ;;  %vm765_vm10 = vcmp.ge.f32.partialorder %v2242_v36, %v2368_v9 }
 0x3fb   : > { %vm766_vm11 = vcmp.ge.f32.partialorder %v2252_v40, %v2371_v11  ;;  %1669 = vpow2.f32 %v799_v56  ;;  %v2418_v12 = vsel %vm762_vm0, %v2212_v29, %v2355_v62  ;;  %v2425_v58 = vsel %vm763_vm2, %v2219_v30, %v2358_v63 }
 0x3fc   : > { %1671 = vpow2.f32 %v801_v57  ;;  %v912_v44 = vrot.slane %v2398_v2, 7  ;;  %v914_v4 = vrot.slane %v2405_v3, 6  ;;  %v2434_v8 = vsel %vm759_vm13, %v2228_v34, %v2344_v59 }
 0x3fd   : > { %1673 = vpow2.f32 %v803_v5  ;;  %v2441_v46 = vsel %vm764_vm1, %v2235_v35, %v2365_v7  ;;  %v2448_v13 = vsel %vm765_vm10, %v2242_v36, %v2368_v9  ;;  %v916_v14 = vrot.slane %v2418_v12, 5 }
 0x3fe   : > { %1675 = vpow2.f32 %v805_v6  ;;  %v913_v53 = vsel %vm491_vm3, %v912_v44, %v2434_v8  ;;  %v2458_v54 = vsel %vm766_vm11, %v2252_v40, %v2371_v11  ;;  %v918_v21 = vrot.slane %v2425_v58, 4 }
 0x3ff   : > { %v915_v20 = vsel %vm493_vm4, %v914_v4, %v913_v53  ;;  %v920_v28 = vrot.slane %v2441_v46, 3  ;;  %v922_v33 = vrot.slane %v2448_v13, 2  ;;  %v924_v41 = vrot.slane %v2458_v54, 1 }
 0x400   : > { %v1662_v16 = vpop.eup %1661  ;;  %v917_v27 = vsel %vm495_vm5, %v916_v14, %v915_v20 }
 0x401   : > { %v919_v32 = vsel %vm497_vm6, %v918_v21, %v917_v27 }
 0x402   : > { %v1664_v55 = vpop.eup %1663  ;;  %v921_v38 = vsel %vm499_vm7, %v920_v28, %v919_v32 }
 0x403   : > { %v1666_v37 = vpop.eup %1665  ;;  %v815_v47 = vrot.slane %v1664_v55, 7  ;;  %v740_v50 = vpop.permute.xlu1 %739  ;;  %v923_v51 = vsel %vm501_vm8, %v922_v33, %v921_v38  ;;  %v856_v31 = vmul.f32 %v1664_v55, %v2280_v15 }
 0x404   : > { %v817_v56 = vrot.slane %v1666_v37, 6  ;;  %v2471_v57 = vsel %vm674_vm12, 0.0, %v740_v50  ;;  %v1668_v5 = vpop.eup %1667  ;;  %v2474_v6 = vsel %vm503_vm9, %v924_v41, %v923_v51  ;;  %v855_v51 = vmul.f32 %v1662_v16, %v2301_v45 }
 0x405   : > { %v816_v44 = vsel %vm491_vm3, %v815_v47, %v1662_v16  ;;  %v1670_v4 = vpop.eup %1669  ;;  %927 = vrot.lane.b32.xlu0 %v2474_v6, %s1860_s20  ;;  %v819_v14 = vrot.slane %v1668_v5, 5  ;;  %v864_v27 = vrot.slane %v2471_v57, 1  ;;  %v865_v38 = vrot.slane %v2471_v57, 2 }
 0x406   : > { %v818_v53 = vsel %vm493_vm4, %v817_v56, %v816_v44  ;;  %v1672_v20 = vpop.eup %1671  ;;  %v821_v21 = vrot.slane %v1670_v4, 4  ;;  %v857_v26 = vmul.f32 %v1666_v37, %v2285_v39  ;;  %v866_v23 = vrot.slane %v2471_v57, 3 }
 0x407   : > { %v1674_v28 = vpop.eup %1673  ;;  %v820_v32 = vsel %vm495_vm5, %v819_v14, %v818_v53  ;;  %v823_v33 = vrot.slane %v1672_v20, 3  ;;  %v867_v14 = vrot.slane %v2471_v57, 4  ;;  %v879_v22 = vadd.f32 %v855_v51, %v2471_v57 }
 0x408   : > { %v1676_v41 = vpop.eup %1675  ;;  %v822_v47 = vsel %vm497_vm6, %v821_v21, %v820_v32  ;;  %v825_v50 = vrot.slane %v1674_v28, 2  ;;  %v880_v19 = vadd.f32 %v864_v27, %v856_v31  ;;  %v881_v32 = vadd.f32 %v865_v38, %v857_v26 }
 0x409   : > { %v824_v56 = vsel %vm499_vm7, %v823_v33, %v822_v47  ;;  %v827_v44 = vrot.slane %v1676_v41, 1  ;;  %v858_v16 = vmul.f32 %v1668_v5, %v2290_v52  ;;  %v859_v55 = vmul.f32 %v1670_v4, %v2295_v0 }
 0x40a   : > { %v826_v53 = vsel %vm501_vm8, %v825_v50, %v824_v56  ;;  %v860_v37 = vmul.f32 %v1672_v20, %v2306_v48  ;;  %v861_v47 = vmul.f32 %v1674_v28, %v2312_v49  ;;  %v862_v50 = vmul.f32 %v1676_v41, %v2320_v42 }
 0x40b   : > { %v828_v21 = vsel %vm503_vm9, %v827_v44, %v826_v53  ;;  %v868_v56 = vrot.slane %v2471_v57, 5  ;;  %v869_v51 = vrot.slane %v2471_v57, 6  ;;  %v870_v31 = vrot.slane %v2471_v57, 7 }
 0x40c   : > { %v830_v33 = vmul.f32 %v828_v21, %v2471_v57  ;;  %v882_v27 = vadd.f32 %v866_v23, %v858_v16  ;;  %v883_v16 = vadd.f32 %v867_v14, %v859_v55  ;;  %vm3074_vm12 = vcmask 1047680  }
 0x40d   : > { %v884_v18 = vadd.f32 %v868_v56, %v860_v37 }
 0x40e   : > { %v832_v26 = vrot.slane %v830_v33, 1  ;;  %v833_v38 = vrot.slane %v830_v33, 2  ;;  %v834_v5 = vrot.slane %v830_v33, 3  ;;  %v835_v44 = vrot.slane %v830_v33, 4 }
 0x40f   : > { %v836_v4 = vrot.slane %v830_v33, 5  ;;  %v837_v53 = vrot.slane %v830_v33, 6  ;;  %v838_v21 = vrot.slane %v830_v33, 7  ;;  %v847_v20 = vadd.f32 %v830_v33, %v2301_v45 }
 0x410   : > { %v848_v28 = vadd.f32 %v832_v26, %v2280_v15  ;;  %v849_v41 = vadd.f32 %v833_v38, %v2285_v39  ;;  %v850_v17 = vadd.f32 %v834_v5, %v2290_v52  ;;  %v851_v10 = vadd.f32 %v835_v44, %v2295_v0 }
 0x411   : > { %v852_v57 = vadd.f32 %v836_v4, %v2306_v48  ;;  %v853_v23 = vadd.f32 %v837_v53, %v2312_v49  ;;  %v854_v1 = vadd.f32 %v838_v21, %v2320_v42  ;;  %v885_v52 = vadd.f32 %v869_v51, %v861_v47 }
 0x412   : > { %v2513_v45 = vsel %vm760_vm14, %v848_v28, %v880_v19  ;;  %v2518_v15 = vsel %vm761_vm15, %v849_v41, %v881_v32  ;;  %v2523_v39 = vsel %vm762_vm0, %v850_v17, %v882_v27  ;;  %v2528_v0 = vsel %vm763_vm2, %v851_v10, %v883_v16  ;;  %vm3076_vm14 = vmmov %vm3074_vm12 }
 0x413   : > { %v946_v24 = vrot.slane %v2513_v45, 7  ;;  %v886_v19 = vadd.f32 %v870_v31, %v862_v50  ;;  %v2534_v25 = vsel %vm759_vm13, %v847_v20, %v879_v22  ;;  %v2539_v29 = vsel %vm764_vm1, %v852_v57, %v884_v18  ;;  %vm3075_vm13 = vmmov %vm3074_vm12 }
 0x414   : > { %v948_v17 = vrot.slane %v2518_v15, 6  ;;  %v2545_v10 = vsel %vm765_vm10, %v853_v23, %v885_v52  ;;  %v950_v48 = vrot.slane %v2523_v39, 5  ;;  %v952_v34 = vrot.slane %v2528_v0, 4  ;;  %vm3077_vm15 = vmmov %vm3074_vm12 }
 0x415   : > { %v947_v30 = vsel %vm491_vm3, %v946_v24, %v2534_v25  ;;  %v2553_v22 = vsel %vm766_vm11, %v854_v1, %v886_v19  ;;  %v954_v36 = vrot.slane %v2539_v29, 3  ;;  %v956_v42 = vrot.slane %v2545_v10, 2 }
 0x416   : > { %v949_v18 = vsel %vm493_vm4, %v948_v17, %v947_v30  ;;  %v958_v60 = vrot.slane %v2553_v22, 1  ;;  %vm903_vm0 = vcmp.ge.s32.totalorder %v2060_v43, 12 }
 0x417   : > { %v951_v35 = vsel %vm495_vm5, %v950_v48, %v949_v18 }
 0x418   : > { %v953_v49 = vsel %vm497_vm6, %v952_v34, %v951_v35 }
 0x419   : > { %v955_v59 = vsel %vm499_vm7, %v954_v36, %v953_v49 }
 0x41a   : > { %v957_v40 = vsel %vm501_vm8, %v956_v42, %v955_v59 }
 0x41b   : > { %v959_v1 = vsel %vm503_vm9, %v958_v60, %v957_v40 }
 0x41c   : > { %961 = vrot.lane.b32.xlu1 %v959_v1, %s1860_s20 }
 0x477   : > { %v928_v61 = vpop.permute.xlu0 %927 }
 0x478   : > { %v929_v62 = vsel %vm3074_vm12, %v928_v61, %v2474_v6 }
 0x479   : > { %930 = vrot.lane.b32.xlu0 %v929_v62, %s1860_s20 }
 0x48e   : > { %v962_v63 = vpop.permute.xlu1 %961 }
 0x48f   : > { %v963_v7 = vsel %vm3075_vm13, %v962_v63, %v959_v1 }
 0x490   : > { %964 = vrot.lane.b32.xlu1 %v963_v7, %s1860_s20 }
 0x4eb   : > { %v931_v9 = vpop.permute.xlu0 %930 }
 0x4ec   : > { %v932_v11 = vsel %vm3076_vm14, %v931_v9, %v2474_v6 }
 0x4ed   : > { %934 = vrot.lane.b32.xlu0 %v932_v11, %s1863_s28 }
 0x502   : > { %v965_v14 = vpop.permute.xlu1 %964 }
 0x503   : > { %v966_v32 = vsel %vm3077_vm15, %v965_v14, %v959_v1 }
 0x504   : > { %968 = vrot.lane.b32.xlu1 %v966_v32, %s1863_s28 }
 0x55f   : > { %v935_v55 = vpop.permute.xlu0 %934 }
 0x560   : > { %v2577_v33 = vsel %vm903_vm0, -inf, %v935_v55 }
 0x561   : > { %v2580_v37 = vrot.slane %v2577_v33, 1  ;;  %v2583_v47 = vrot.slane %v2577_v33, 2  ;;  %v996_v6 = vsub.f32 %v2434_v8, %v2577_v33  ;;  %v2588_v50 = vrot.slane %v2577_v33, 3 }
 0x562   : > { %v2591_v56 = vrot.slane %v2577_v33, 4  ;;  %v2598_v26 = vrot.slane %v2577_v33, 5  ;;  %v2601_v38 = vrot.slane %v2577_v33, 6  ;;  %v2604_v5 = vrot.slane %v2577_v33, 7 }
 0x563   : > { %v997_v51 = vsub.f32 %v2398_v2, %v2580_v37  ;;  %v998_v31 = vsub.f32 %v2405_v3, %v2583_v47  ;;  %v1004_v27 = vand.u32 2147483647, %v996_v6  ;;  %vm988_vm2 = vcmp.ge.f32.partialorder %v2434_v8, %v2577_v33 }
 0x564   : > { %vm989_vm1 = vcmp.ge.f32.partialorder %v2398_v2, %v2580_v37  ;;  %vm990_vm10 = vcmp.ge.f32.partialorder %v2405_v3, %v2583_v47  ;;  %v999_v21 = vsub.f32 %v2418_v12, %v2588_v50  ;;  %v1000_v20 = vsub.f32 %v2425_v58, %v2591_v56 }
 0x565   : > { %v1005_v44 = vand.u32 2147483647, %v997_v51  ;;  %v1006_v4 = vand.u32 2147483647, %v998_v31  ;;  %v1012_v53 = vsub.f32 0.0, %v1004_v27  ;;  %v1001_v23 = vsub.f32 %v2441_v46, %v2598_v26 }
 0x566   : > { %v1002_v16 = vsub.f32 %v2448_v13, %v2601_v38  ;;  %v1003_v52 = vsub.f32 %v2458_v54, %v2604_v5  ;;  %v1007_v24 = vand.u32 2147483647, %v999_v21  ;;  %v1008_v19 = vand.u32 2147483647, %v1000_v20 }
 0x567   : > { %v1013_v28 = vsub.f32 0.0, %v1005_v44  ;;  %v1014_v41 = vsub.f32 0.0, %v1006_v4  ;;  %v1020_v57 = vmul.f32 1.442695, %v1012_v53  ;;  %v1009_v48 = vand.u32 2147483647, %v1001_v23 }
 0x568   : > { %v1010_v18 = vand.u32 2147483647, %v1002_v16  ;;  %v1011_v34 = vand.u32 2147483647, %v1003_v52  ;;  %v1015_v35 = vsub.f32 0.0, %v1007_v24  ;;  %v1016_v36 = vsub.f32 0.0, %v1008_v19 }
 0x569   : > { %1677 = vpow2.f32 %v1020_v57  ;;  %v1022_v17 = vmul.f32 1.442695, %v1013_v28  ;;  %v1024_v30 = vmul.f32 1.442695, %v1014_v41  ;;  %vm991_vm11 = vcmp.ge.f32.partialorder %v2418_v12, %v2588_v50 }
 0x56a   : > { %vm992_vm12 = vcmp.ge.f32.partialorder %v2425_v58, %v2591_v56  ;;  %v1017_v49 = vsub.f32 0.0, %v1009_v48  ;;  %v1018_v42 = vsub.f32 0.0, %v1010_v18  ;;  %v1019_v59 = vsub.f32 0.0, %v1011_v34 }
 0x56b   : > { %1679 = vpow2.f32 %v1022_v17  ;;  %v1026_v60 = vmul.f32 1.442695, %v1015_v35  ;;  %v1028_v40 = vmul.f32 1.442695, %v1016_v36  ;;  %v2631_v61 = vsel %vm989_vm1, %v2398_v2, %v2580_v37 }
 0x56c   : > { %1681 = vpow2.f32 %v1024_v30  ;;  %v1030_v1 = vmul.f32 1.442695, %v1017_v49  ;;  %v2638_v62 = vsel %vm990_vm10, %v2405_v3, %v2583_v47  ;;  %vm993_vm13 = vcmp.ge.f32.partialorder %v2441_v46, %v2598_v26 }
 0x56d   : > { %1683 = vpow2.f32 %v1026_v60  ;;  %v1032_v63 = vmul.f32 1.442695, %v1018_v42  ;;  %v1034_v7 = vmul.f32 1.442695, %v1019_v59  ;;  %vm994_vm14 = vcmp.ge.f32.partialorder %v2448_v13, %v2601_v38 }
 0x56e   : > { %vm995_vm15 = vcmp.ge.f32.partialorder %v2458_v54, %v2604_v5  ;;  %1685 = vpow2.f32 %v1028_v40  ;;  %v2651_v9 = vsel %vm991_vm11, %v2418_v12, %v2588_v50  ;;  %v2658_v11 = vsel %vm992_vm12, %v2425_v58, %v2591_v56 }
 0x56f   : > { %1687 = vpow2.f32 %v1030_v1  ;;  %v1141_v14 = vrot.slane %v2631_v61, 7  ;;  %v1143_v32 = vrot.slane %v2638_v62, 6  ;;  %v2667_v55 = vsel %vm988_vm2, %v2434_v8, %v2577_v33 }
 0x570   : > { %1689 = vpow2.f32 %v1032_v63  ;;  %v2674_v6 = vsel %vm993_vm13, %v2441_v46, %v2598_v26  ;;  %v2681_v51 = vsel %vm994_vm14, %v2448_v13, %v2601_v38  ;;  %v1145_v27 = vrot.slane %v2651_v9, 5 }
 0x571   : > { %1691 = vpow2.f32 %v1034_v7  ;;  %v1142_v31 = vsel %vm491_vm3, %v1141_v14, %v2667_v55  ;;  %v2691_v4 = vsel %vm995_vm15, %v2458_v54, %v2604_v5  ;;  %v1147_v21 = vrot.slane %v2658_v11, 4 }
 0x572   : > { %v1144_v53 = vsel %vm493_vm4, %v1143_v32, %v1142_v31  ;;  %v1149_v28 = vrot.slane %v2674_v6, 3  ;;  %v1151_v23 = vrot.slane %v2681_v51, 2  ;;  %v1153_v24 = vrot.slane %v2691_v4, 1 }
 0x573   : > { %v1678_v44 = vpop.eup %1677  ;;  %v1146_v20 = vsel %vm495_vm5, %v1145_v27, %v1144_v53 }
 0x574   : > { %v1148_v57 = vsel %vm497_vm6, %v1147_v21, %v1146_v20  ;;  %v1084_v21 = vmul.f32 %v1678_v44, %v2534_v25 }
 0x575   : > { %v1680_v41 = vpop.eup %1679  ;;  %v1150_v52 = vsel %vm499_vm7, %v1149_v28, %v1148_v57 }
 0x576   : > { %v1682_v16 = vpop.eup %1681  ;;  %v1044_v19 = vrot.slane %v1680_v41, 7  ;;  %v969_v17 = vpop.permute.xlu1 %968  ;;  %v1152_v30 = vsel %vm501_vm8, %v1151_v23, %v1150_v52  ;;  %v1085_v20 = vmul.f32 %v1680_v41, %v2513_v45 }
 0x577   : > { %v1046_v48 = vrot.slane %v1682_v16, 6  ;;  %v2704_v18 = vsel %vm903_vm0, 0.0, %v969_v17  ;;  %v1684_v34 = vpop.eup %1683  ;;  %v2707_v35 = vsel %vm503_vm9, %v1153_v24, %v1152_v30  ;;  %v1086_v23 = vmul.f32 %v1682_v16, %v2518_v15 }
 0x578   : > { %v1045_v36 = vsel %vm491_vm3, %v1044_v19, %v1678_v44  ;;  %v1686_v49 = vpop.eup %1685  ;;  %1156 = vrot.lane.b32.xlu0 %v2707_v35, %s1860_s20  ;;  %v1048_v59 = vrot.slane %v1684_v34, 5  ;;  %v1093_v1 = vrot.slane %v2704_v18, 1  ;;  %v1094_v32 = vrot.slane %v2704_v18, 2 }
 0x579   : > { %v1047_v42 = vsel %vm493_vm4, %v1046_v48, %v1045_v36  ;;  %v1688_v60 = vpop.eup %1687  ;;  %v1050_v40 = vrot.slane %v1686_v49, 4  ;;  %v1095_v52 = vrot.slane %v2704_v18, 3  ;;  %v1096_v19 = vrot.slane %v2704_v18, 4 }
 0x57a   : > { %v1690_v63 = vpop.eup %1689  ;;  %v1049_v7 = vsel %vm495_vm5, %v1048_v59, %v1047_v42  ;;  %v1052_v14 = vrot.slane %v1688_v60, 3  ;;  %v1108_v17 = vadd.f32 %v1084_v21, %v2704_v18  ;;  %v1109_v30 = vadd.f32 %v1093_v1, %v1085_v20 }
 0x57b   : > { %v1692_v31 = vpop.eup %1691  ;;  %v1051_v27 = vsel %vm497_vm6, %v1050_v40, %v1049_v7  ;;  %v1054_v53 = vrot.slane %v1690_v63, 2  ;;  %v1110_v36 = vadd.f32 %v1094_v32, %v1086_v23  ;;  %v1087_v44 = vmul.f32 %v1684_v34, %v2523_v39 }
 0x57c   : > { %v1053_v28 = vsel %vm499_vm7, %v1052_v14, %v1051_v27  ;;  %v1056_v57 = vrot.slane %v1692_v31, 1  ;;  %v1088_v41 = vmul.f32 %v1686_v49, %v2528_v0  ;;  %v1089_v16 = vmul.f32 %v1688_v60, %v2539_v29 }
 0x57d   : > { %v1055_v24 = vsel %vm501_vm8, %v1054_v53, %v1053_v28  ;;  %v1090_v59 = vmul.f32 %v1690_v63, %v2545_v10  ;;  %v1091_v40 = vmul.f32 %v1692_v31, %v2553_v22  ;;  %v1097_v7 = vrot.slane %v2704_v18, 5 }
 0x57e   : > { %v1057_v48 = vsel %vm503_vm9, %v1056_v57, %v1055_v24  ;;  %v1098_v14 = vrot.slane %v2704_v18, 6  ;;  %v1099_v1 = vrot.slane %v2704_v18, 7  ;;  %v1111_v27 = vadd.f32 %v1095_v52, %v1087_v44 }
 0x57f   : > { %v1059_v42 = vmul.f32 %v1057_v48, %v2704_v18  ;;  %v1112_v24 = vadd.f32 %v1096_v19, %v1088_v41  ;;  %v1113_v48 = vadd.f32 %v1097_v7, %v1089_v16  ;;  %vm3078_vm0 = vcmask 1047680  }
 0x581   : > { %v1061_v32 = vrot.slane %v1059_v42, 1  ;;  %v1062_v53 = vrot.slane %v1059_v42, 2  ;;  %v1063_v34 = vrot.slane %v1059_v42, 3  ;;  %v1064_v21 = vrot.slane %v1059_v42, 4 }
 0x582   : > { %v1065_v49 = vrot.slane %v1059_v42, 5  ;;  %v1066_v20 = vrot.slane %v1059_v42, 6  ;;  %v1067_v28 = vrot.slane %v1059_v42, 7  ;;  %v1076_v60 = vadd.f32 %v1059_v42, %v2534_v25 }
 0x583   : > { %v1077_v63 = vadd.f32 %v1061_v32, %v2513_v45  ;;  %v1078_v31 = vadd.f32 %v1062_v53, %v2518_v15  ;;  %v1079_v57 = vadd.f32 %v1063_v34, %v2523_v39  ;;  %v1080_v23 = vadd.f32 %v1064_v21, %v2528_v0 }
 0x584   : > { %v1081_v18 = vadd.f32 %v1065_v49, %v2539_v29  ;;  %v1082_v52 = vadd.f32 %v1066_v20, %v2545_v10  ;;  %v1083_v44 = vadd.f32 %v1067_v28, %v2553_v22  ;;  %v1114_v39 = vadd.f32 %v1098_v14, %v1090_v59 }
 0x585   : > { %v2746_v25 = vsel %vm989_vm1, %v1077_v63, %v1109_v30  ;;  %v2751_v45 = vsel %vm990_vm10, %v1078_v31, %v1110_v36  ;;  %v2756_v15 = vsel %vm991_vm11, %v1079_v57, %v1111_v27  ;;  %v2761_v0 = vsel %vm992_vm12, %v1080_v23, %v1112_v24  ;;  %vm3080_vm1 = vmmov %vm3078_vm0 }
 0x586   : > { %v1175_v2 = vrot.slane %v2746_v25, 7  ;;  %v1115_v29 = vadd.f32 %v1099_v1, %v1091_v40  ;;  %v2767_v3 = vsel %vm988_vm2, %v1076_v60, %v1108_v17  ;;  %v2772_v12 = vsel %vm993_vm13, %v1081_v18, %v1113_v48  ;;  %vm3079_vm2 = vmmov %vm3078_vm0 }
 0x587   : > { %v1177_v10 = vrot.slane %v2751_v45, 6  ;;  %v2778_v58 = vsel %vm994_vm14, %v1082_v52, %v1114_v39  ;;  %v1179_v37 = vrot.slane %v2756_v15, 5  ;;  %v1181_v33 = vrot.slane %v2761_v0, 4  ;;  %vm3081_vm10 = vmmov %vm3078_vm0 }
 0x588   : > { %v1176_v22 = vsel %vm491_vm3, %v1175_v2, %v2767_v3  ;;  %v2786_v8 = vsel %vm995_vm15, %v1083_v44, %v1115_v29  ;;  %v1183_v13 = vrot.slane %v2772_v12, 3  ;;  %v1185_v56 = vrot.slane %v2778_v58, 2 }
 0x589   : > { %v1178_v46 = vsel %vm493_vm4, %v1177_v10, %v1176_v22  ;;  %v1187_v38 = vrot.slane %v2786_v8, 1  ;;  %vm1132_vm11 = vcmp.ge.s32.totalorder %v2060_v43, 8 }
 0x58a   : > { %v1180_v47 = vsel %vm495_vm5, %v1179_v37, %v1178_v46 }
 0x58b   : > { %v1182_v50 = vsel %vm497_vm6, %v1181_v33, %v1180_v47 }
 0x58c   : > { %v1184_v26 = vsel %vm499_vm7, %v1183_v13, %v1182_v50 }
 0x58d   : > { %v1186_v54 = vsel %vm501_vm8, %v1185_v56, %v1184_v26 }
 0x58e   : > { %v1188_v5 = vsel %vm503_vm9, %v1187_v38, %v1186_v54 }
 0x58f   : > { %1190 = vrot.lane.b32.xlu1 %v1188_v5, %s1860_s20 }
 0x5ea   : > { %v1157_v19 = vpop.permute.xlu0 %1156 }
 0x5eb   : > { %v1158_v17 = vsel %vm3078_vm0, %v1157_v19, %v2707_v35 }
 0x5ec   : > { %1159 = vrot.lane.b32.xlu0 %v1158_v17, %s1860_s20 }
 0x601   : > { %v1191_v30 = vpop.permute.xlu1 %1190 }
 0x602   : > { %v1192_v36 = vsel %vm3079_vm2, %v1191_v30, %v1188_v5 }
 0x603   : > { %1193 = vrot.lane.b32.xlu1 %v1192_v36, %s1860_s20 }
 0x65e   : > { %v1160_v41 = vpop.permute.xlu0 %1159 }
 0x65f   : > { %v1161_v42 = vsel %vm3080_vm1, %v1160_v41, %v2707_v35 }
 0x660   : > { %1163 = vrot.lane.b32.xlu0 %v1161_v42, %s1864_s4 }
 0x675   : > { %v1194_v16 = vpop.permute.xlu1 %1193 }
 0x676   : > { %v1195_v59 = vsel %vm3081_vm10, %v1194_v16, %v1188_v5 }
 0x677   : > { %1197 = vrot.lane.b32.xlu1 %v1195_v59, %s1864_s4 }
 0x6d2   : > { %v1164_v40 = vpop.permute.xlu0 %1163 }
 0x6d3   : > { %v2810_v7 = vsel %vm1132_vm11, -inf, %v1164_v40 }
 0x6d4   : > { %v2813_v14 = vrot.slane %v2810_v7, 1  ;;  %v2816_v1 = vrot.slane %v2810_v7, 2  ;;  %v2819_v35 = vrot.slane %v2810_v7, 3  ;;  %v2822_v27 = vrot.slane %v2810_v7, 4 }
 0x6d5   : > { %v1225_v32 = vsub.f32 %v2667_v55, %v2810_v7  ;;  %v2835_v28 = vrot.slane %v2810_v7, 5  ;;  %v2838_v60 = vrot.slane %v2810_v7, 6  ;;  %v2841_v52 = vrot.slane %v2810_v7, 7 }
 0x6d6   : > { %v1226_v53 = vsub.f32 %v2631_v61, %v2813_v14  ;;  %v1227_v34 = vsub.f32 %v2638_v62, %v2816_v1  ;;  %v1228_v21 = vsub.f32 %v2651_v9, %v2819_v35  ;;  %v1229_v49 = vsub.f32 %v2658_v11, %v2822_v27 }
 0x6d7   : > { %v1233_v20 = vand.u32 2147483647, %v1225_v32  ;;  %v1230_v29 = vsub.f32 %v2674_v6, %v2835_v28  ;;  %v1231_v46 = vsub.f32 %v2681_v51, %v2838_v60  ;;  %v1232_v47 = vsub.f32 %v2691_v4, %v2841_v52 }
 0x6d8   : > { %v1234_v63 = vand.u32 2147483647, %v1226_v53  ;;  %v1235_v31 = vand.u32 2147483647, %v1227_v34  ;;  %v1236_v57 = vand.u32 2147483647, %v1228_v21  ;;  %v1388_v21 = vstv %s1579_s16 }
 0x6d9   : > { %v1237_v23 = vand.u32 2147483647, %v1229_v49  ;;  %v1241_v18 = vsub.f32 0.0, %v1233_v20  ;;  %v1238_v13 = vand.u32 2147483647, %v1230_v29  ;;  %vm1217_vm12 = vcmp.ge.f32.partialorder %v2667_v55, %v2810_v7 }
 0x6da   : > { %v1242_v24 = vsub.f32 0.0, %v1234_v63  ;;  %v1243_v48 = vsub.f32 0.0, %v1235_v31  ;;  %v1244_v44 = vsub.f32 0.0, %v1236_v57  ;;  %v1239_v50 = vand.u32 2147483647, %v1231_v46 }
 0x6db   : > { %v1245_v39 = vsub.f32 0.0, %v1237_v23  ;;  %v1249_v2 = vmul.f32 1.442695, %v1241_v18  ;;  %v1240_v56 = vand.u32 2147483647, %v1232_v47  ;;  %v1246_v26 = vsub.f32 0.0, %v1238_v13 }
 0x6dc   : > { %v1251_v10 = vmul.f32 1.442695, %v1242_v24  ;;  %v1253_v22 = vmul.f32 1.442695, %v1243_v48  ;;  %v1255_v37 = vmul.f32 1.442695, %v1244_v44  ;;  %vm1218_vm13 = vcmp.ge.f32.partialorder %v2631_v61, %v2813_v14 }
 0x6dd   : > { %1693 = vpow2.f32 %v1249_v2  ;;  %v1257_v33 = vmul.f32 1.442695, %v1245_v39  ;;  %v1247_v38 = vsub.f32 0.0, %v1239_v50  ;;  %v1248_v54 = vsub.f32 0.0, %v1240_v56  ;;  %v3082_v48 = vld [vmem:[#allocation11_spill] sm:$0xff] }
 0x6de   : > { %1695 = vpow2.f32 %v1251_v10  ;;  %v1259_v5 = vmul.f32 1.442695, %v1246_v26  ;;  %v2858_v44 = vadd.s32 %v1388_v21, %v3082_v48  ;;  %vm1219_vm14 = vcmp.ge.f32.partialorder %v2638_v62, %v2816_v1 }
 0x6df   : > { %1697 = vpow2.f32 %v1253_v22  ;;  %v1261_v19 = vmul.f32 1.442695, %v1247_v38  ;;  %v1263_v17 = vmul.f32 1.442695, %v1248_v54  ;;  %vm1220_vm15 = vcmp.ge.f32.partialorder %v2651_v9, %v2819_v35 }
 0x6e0   : > { %1699 = vpow2.f32 %v1255_v37  ;;  %vm1221_vm0 = vcmp.ge.f32.partialorder %v2658_v11, %v2822_v27  ;;  %vm1222_vm2 = vcmp.ge.f32.partialorder %v2674_v6, %v2835_v28  ;;  %vm1223_vm1 = vcmp.ge.f32.partialorder %v2681_v51, %v2838_v60 }
 0x6e1   : > { %1701 = vpow2.f32 %v1257_v33  ;;  %vm1224_vm10 = vcmp.ge.f32.partialorder %v2691_v4, %v2841_v52 }
 0x6e2   : > { %1703 = vpow2.f32 %v1259_v5 }
 0x6e3   : > { %1705 = vpow2.f32 %v1261_v19 }
 0x6e4   : > { %1707 = vpow2.f32 %v1263_v17 }
 0x6e7   : > { %v1694_v30 = vpop.eup %1693 }
 0x6e8   : > { %v1696_v36 = vpop.eup %1695  ;;  %v1313_v33 = vmul.f32 %v1694_v30, %v2767_v3 }
 0x6e9   : > { %v1698_v41 = vpop.eup %1697  ;;  %v1273_v42 = vrot.slane %v1696_v36, 7  ;;  %v1198_v40 = vpop.permute.xlu1 %1197  ;;  %v1314_v47 = vmul.f32 %v1696_v36, %v2746_v25 }
 0x6ea   : > { %v1700_v16 = vpop.eup %1699  ;;  %v1275_v59 = vrot.slane %v1698_v41, 6  ;;  %v2854_v63 = vsel %vm1132_vm11, 0.0, %v1198_v40  ;;  %v1315_v13 = vmul.f32 %v1698_v41, %v2751_v45  ;;  %vm1390_vm11 = vcmp.lt.s32.totalorder %v2858_v44, 10 }
 0x6eb   : > { %v1702_v32 = vpop.eup %1701  ;;  %v1274_v53 = vsel %vm491_vm3, %v1273_v42, %v1694_v30  ;;  %v1277_v20 = vrot.slane %v1700_v16, 5  ;;  %v1322_v39 = vrot.slane %v2854_v63, 1  ;;  %v1323_v2 = vrot.slane %v2854_v63, 2 }
 0x6ec   : > { %v1276_v34 = vsel %vm493_vm4, %v1275_v59, %v1274_v53  ;;  %v1704_v49 = vpop.eup %1703  ;;  %v1279_v57 = vrot.slane %v1702_v32, 4  ;;  %v1324_v10 = vrot.slane %v2854_v63, 3  ;;  %v1325_v22 = vrot.slane %v2854_v63, 4 }
 0x6ed   : > { %v1706_v31 = vpop.eup %1705  ;;  %v1278_v18 = vsel %vm495_vm5, %v1277_v20, %v1276_v34  ;;  %v1281_v24 = vrot.slane %v1704_v49, 3  ;;  %v1316_v56 = vmul.f32 %v1700_v16, %v2756_v15  ;;  %v1317_v26 = vmul.f32 %v1702_v32, %v2761_v0 }
 0x6ee   : > { %v1708_v23 = vpop.eup %1707  ;;  %v1280_v43 = vsel %vm497_vm6, %v1279_v57, %v1278_v18  ;;  %v1283_v29 = vrot.slane %v1706_v31, 2  ;;  %v1326_v38 = vrot.slane %v2854_v63, 5  ;;  %v1327_v5 = vrot.slane %v2854_v63, 6 }
 0x6ef   : > { %v1282_v37 = vsel %vm499_vm7, %v1281_v24, %v1280_v43  ;;  %v1285_v46 = vrot.slane %v1708_v23, 1  ;;  %v1328_v19 = vrot.slane %v2854_v63, 7  ;;  %v1337_v17 = vadd.f32 %v1313_v33, %v2854_v63 }
 0x6f0   : > { %v1284_v50 = vsel %vm501_vm8, %v1283_v29, %v1282_v37  ;;  %v1338_v36 = vadd.f32 %v1322_v39, %v1314_v47  ;;  %v1339_v41 = vadd.f32 %v1323_v2, %v1315_v13  ;;  %v1340_v42 = vadd.f32 %v1324_v10, %v1316_v56 }
 0x6f1   : > { %v1286_v54 = vsel %vm503_vm9, %v1285_v46, %v1284_v50  ;;  %v1341_v16 = vadd.f32 %v1325_v22, %v1317_v26  ;;  %v1318_v2 = vmul.f32 %v1704_v49, %v2772_v12  ;;  %v1319_v43 = vmul.f32 %v1706_v31, %v2778_v58 }
 0x6f2   : > { %v1288_v30 = vmul.f32 %v1286_v54, %v2854_v63  ;;  %v1865_v37 = vmov 0.0   ;;  %v1353_v44 = vsel %vm1217_vm12, %v2667_v55, %v2810_v7  ;;  %v1356_v55 = vsel %vm1220_vm15, %v2651_v9, %v2819_v35 }
 0x6f3   : > { %v1580_v46 = vsel %vm1390_vm11, 1.0, %v1865_v37 }
 0x6f4   : > { %v1290_v59 = vrot.slane %v1288_v30, 1  ;;  %v1291_v40 = vrot.slane %v1288_v30, 2  ;;  %v1292_v32 = vrot.slane %v1288_v30, 3  ;;  %v1293_v53 = vrot.slane %v1288_v30, 4 }
 0x6f5   : > { %v1294_v34 = vrot.slane %v1288_v30, 5  ;;  %v1295_v21 = vrot.slane %v1288_v30, 6  ;;  %v1296_v20 = vrot.slane %v1288_v30, 7  ;;  %v1305_v57 = vadd.f32 %v1288_v30, %v2767_v3 }
 0x6f6   : > { %v1306_v18 = vadd.f32 %v1290_v59, %v2746_v25  ;;  %v1307_v24 = vadd.f32 %v1291_v40, %v2751_v45  ;;  %v1308_v48 = vadd.f32 %v1292_v32, %v2756_v15  ;;  %v1309_v63 = vadd.f32 %v1293_v53, %v2761_v0 }
 0x6f7   : > { %v1310_v39 = vadd.f32 %v1294_v34, %v2772_v12  ;;  %v1345_v29 = vsel %vm1217_vm12, %v1305_v57, %v1337_v17  ;;  %v1311_v3 = vadd.f32 %v1295_v21, %v2778_v58  ;;  %v1320_v25 = vmul.f32 %v1708_v23, %v2786_v8  ;;  %v3083_v34 = vld [vmem:[#allocation14_spill] sm:$0xff] }
 0x6f8   : > { %v1346_v45 = vsel %vm1218_vm13, %v1306_v18, %v1338_v36  ;;  %v1347_v15 = vsel %vm1219_vm14, %v1307_v24, %v1339_v41  ;;  %v1312_v0 = vadd.f32 %v1296_v20, %v2786_v8  ;;  %v1342_v12 = vadd.f32 %v1326_v38, %v1318_v2  ;;  %v3084_v20 = vld [vmem:[#allocation12_spill] sm:$0xff] }
 0x6f9   : > { %v1348_v49 = vsel %vm1220_vm15, %v1308_v48, %v1340_v42  ;;  %1709 = vlog2.f32 %v1345_v29  ;;  %v1343_v58 = vadd.f32 %v1327_v5, %v1319_v43  ;;  %v1349_v31 = vsel %vm1221_vm0, %v1309_v63, %v1341_v16  ;;  %v3085_v48 = vld [vmem:[#allocation13_spill] sm:$0xff]  ;;  %v3086_v43 = vld [vmem:[#allocation15_spill] sm:$0xff] }
 0x6fa   : > { %1711 = vlog2.f32 %v1346_v45  ;;  %v1344_v23 = vadd.f32 %v1328_v19, %v1320_v25  ;;  %v1350_v8 = vsel %vm1222_vm2, %v1310_v39, %v1342_v12  ;;  %v1402_v47 = vrot.slane %v1580_v46, 1  ;;  %v3088_v12 = vld [vmem:[#allocation17_spill] sm:$0xff] }
 0x6fb   : > { %1713 = vlog2.f32 %v1347_v15  ;;  %v1351_v10 = vsel %vm1223_vm1, %v1311_v3, %v1343_v58  ;;  %v1403_v13 = vrot.slane %v1580_v46, 2  ;;  %v1404_v26 = vrot.slane %v1580_v46, 3  ;;  %v3087_v3 = vld [vmem:[#allocation16_spill] sm:$0xff] }
 0x6fc   : > { %1715 = vlog2.f32 %v1348_v49  ;;  %v1352_v22 = vsel %vm1224_vm10, %v1312_v0, %v1344_v23  ;;  %v1405_v38 = vrot.slane %v1580_v46, 4  ;;  %v1406_v54 = vrot.slane %v1580_v46, 5 }
 0x6fd   : > { %1717 = vlog2.f32 %v1349_v31  ;;  %v1407_v17 = vrot.slane %v1580_v46, 6  ;;  %v1408_v30 = vrot.slane %v1580_v46, 7  ;;  %v1354_v41 = vsel %vm1218_vm13, %v2631_v61, %v2813_v14 }
 0x6fe   : > { %1719 = vlog2.f32 %v1350_v8  ;;  %v1355_v42 = vsel %vm1219_vm14, %v2638_v62, %v2816_v1  ;;  %v1357_v61 = vsel %vm1221_vm0, %v2658_v11, %v2822_v27  ;;  %v1358_v62 = vsel %vm1222_vm2, %v2674_v6, %v2835_v28 }
 0x6ff   : > { %1721 = vlog2.f32 %v1351_v10  ;;  %v1359_v11 = vsel %vm1223_vm1, %v2681_v51, %v2838_v60  ;;  %v1360_v6 = vsel %vm1224_vm10, %v2691_v4, %v2841_v52  ;;  %v3089_v4 = vld [vmem:[#allocation18_spill] sm:$0xff]  ;;  %v3090_v10 = vld [vmem:[#allocation19_spill] sm:$0xff] }
 0x700   : > { %1723 = vlog2.f32 %v1352_v22 }
 0x703   : > { %v1710_v33 = vpop.eup %1709 }
 0x704   : > { %v1712_v50 = vpop.eup %1711  ;;  %v1362_v56 = vmul.f32 0.6931472, %v1710_v33 }
 0x705   : > { %v1714_v5 = vpop.eup %1713  ;;  %v1364_v19 = vmul.f32 0.6931472, %v1712_v50 }
 0x706   : > { %v1716_v36 = vpop.eup %1715  ;;  %v1366_v16 = vmul.f32 0.6931472, %v1714_v5  ;;  %v1377_v59 = vadd.f32 %v1362_v56, %v1353_v44 }
 0x707   : > { %v1718_v40 = vpop.eup %1717  ;;  %v1368_v7 = vmul.f32 0.6931472, %v1716_v36  ;;  %v1378_v14 = vadd.f32 %v1364_v19, %v1354_v41 }
 0x708   : > { %v1720_v32 = vpop.eup %1719  ;;  %v1370_v1 = vmul.f32 0.6931472, %v1718_v40  ;;  %v1379_v53 = vadd.f32 %v1366_v16, %v1355_v42  ;;  %v1393_v21 = vsub.f32 %v1377_v59, %v3083_v34 }
 0x709   : > { %v1722_v9 = vpop.eup %1721  ;;  %v1372_v35 = vmul.f32 0.6931472, %v1720_v32  ;;  %v1380_v27 = vadd.f32 %v1368_v7, %v1356_v55  ;;  %v1394_v57 = vsub.f32 %v1378_v14, %v3084_v20 }
 0x70a   : > { %v1724_v18 = vpop.eup %1723  ;;  %v1374_v28 = vmul.f32 0.6931472, %v1722_v9  ;;  %v1381_v24 = vadd.f32 %v1370_v1, %v1357_v61  ;;  %v1395_v63 = vsub.f32 %v1379_v53, %v3085_v48  ;;  %v1417_v45 = vmul.f32 %v1580_v46, %v1393_v21 }
 0x70b   : > { %v1376_v39 = vmul.f32 0.6931472, %v1724_v18  ;;  %v1382_v2 = vadd.f32 %v1372_v35, %v1358_v62  ;;  %v1396_v29 = vsub.f32 %v1380_v27, %v3086_v43  ;;  %v1418_v51 = vmul.f32 %v1402_v47, %v1394_v57 }
 0x70c   : > { %v1383_v60 = vadd.f32 %v1374_v28, %v1359_v11  ;;  %v1397_v25 = vsub.f32 %v1381_v24, %v3087_v3  ;;  %v1419_v15 = vmul.f32 %v1403_v13, %v1395_v63 }
 0x70d   : > { %v1384_v0 = vadd.f32 %v1376_v39, %v1360_v6  ;;  %v1398_v49 = vsub.f32 %v1382_v2, %v3088_v12  ;;  %v1420_v58 = vmul.f32 %v1404_v26, %v1396_v29  ;;  %v1433_v31 = vrot.slane %v1418_v51, 7 }
 0x70e   : > { %v1399_v52 = vsub.f32 %v1383_v60, %v3089_v4  ;;  %v1421_v23 = vmul.f32 %v1405_v38, %v1397_v25  ;;  %v1435_v8 = vrot.slane %v1419_v15, 6 }
 0x70f   : > { %v1400_v22 = vsub.f32 %v1384_v0, %v3090_v10  ;;  %v1422_v37 = vmul.f32 %v1406_v54, %v1398_v49  ;;  %v1434_v33 = vsel %vm491_vm3, %v1433_v31, %v1417_v45  ;;  %v1437_v47 = vrot.slane %v1420_v58, 5 }
 0x710   : > { %v1423_v50 = vmul.f32 %v1407_v17, %v1399_v52  ;;  %v1436_v56 = vsel %vm493_vm4, %v1435_v8, %v1434_v33  ;;  %v1439_v46 = vrot.slane %v1421_v23, 4  ;;  %vm3091_vm3 = vcmask 130048  }
 0x711   : > { %v1424_v13 = vmul.f32 %v1408_v30, %v1400_v22  ;;  %v1438_v5 = vsel %vm495_vm5, %v1437_v47, %v1436_v56  ;;  %v1441_v44 = vrot.slane %v1422_v37, 3 }
 0x712   : > { %v1440_v26 = vsel %vm497_vm6, %v1439_v46, %v1438_v5  ;;  %v1443_v19 = vrot.slane %v1423_v50, 2 }
 0x713   : > { %v1442_v38 = vsel %vm499_vm7, %v1441_v44, %v1440_v26  ;;  %v1445_v36 = vrot.slane %v1424_v13, 1 }
 0x714   : > { %v1444_v54 = vsel %vm501_vm8, %v1443_v19, %v1442_v38 }
 0x715   : > { %v1446_v41 = vsel %vm503_vm9, %v1445_v36, %v1444_v54 }
 0x716   : > { %v1448_v17 = vsel %vm3091_vm3, %v1446_v41, 0.0 }
 0x717   : > { %1449 = vadd.xlane.f32.xlu0 %v1448_v17 }
 0x7a4   : > { %v1450_v42 = vpop.xlane.xlu0 %1449 }
 0x7a5   : > { %v1451_v30 = vrot.slane %v1450_v42, 4 }
 0x7a7   : > { %v1452_v16 = vadd.f32 %v1451_v30, %v1450_v42 }
 0x7a9   : > { %v1453_v59 = vrot.slane %v1452_v16, 2 }
 0x7ab   : > { %v1454_v40 = vadd.f32 %v1453_v59, %v1452_v16 }
 0x7ad   : > { %v1455_v55 = vrot.slane %v1454_v40, 1 }
 0x7af   : > { %v1456_v61 = vadd.f32 %v1455_v55, %v1454_v40 }
 0x7b1   : > { %1585 = vpush %v1456_v61 }
 0x7e2   : > { %s1586_s23 = spop %1585 }
 0x7e3   : > { %s1458_s25 = smul.f32 0.0009765625, %s1586_s23 }
 0x7e5   : > { %v1459_v7 = vstv %s1458_s25 }
 0x7e6   : > { %1460 = vst [vmem:[%s195_s24] sm:$0xff] %v1459_v7 }
 0x7e7   : > { %1798 = shalt.err (!%p1795_p1)
}
 0x7e8   : > { %s1799_s5 = scalar_lea.hbm %s2991_s8, 128  ;;  %s1803_s14 = scalar_lea.hbm %s3037_s2, 256 }
 0x7e9   : > { %p1800_p11 = scmp.ne.s32.totalorder %s2991_s8, %s1799_s5  ;;  %p1804_p4 = scmp.lt.u32.totalorder %s2991_s8, %s3037_s2 }
 0x7ea   : > { %p1805_p10 = scmp.lt.u32.totalorder %s1803_s14, %s1799_s5  ;;  %p1807_p13 = scmp.lt.u32.totalorder %s1799_s5, %s2991_s8 }
 0x7eb   : > { %p1801_p12 = pnand %p1800_p11, %p3092_p3 }
 0x7ec   : > { %p1806_p6 = por %p1805_p10, %p1804_p4 }
 0x7ed   : > { %p1802_p2 = pneg %p1801_p12 }
 0x7ee   : > { %p1808_p7 = por %p1807_p13, %p1806_p6 }
 0x7f0   : > { %p1809_p5 = pnand %p1808_p7, %p1802_p2 }
 0x7f2   : > { %1812 = shalt.err (!%p1809_p5)
}
 0x7f3   : > { %1591 = dma.vmem_to_hbm [thread:$0]  (%p3092_p3), %s2993_s17, 128, %s2991_s8, %s1462_s30  }
 0x7f4 PF: > { %s1487_s16 = sand.u32 1, %s1843_s9   ;;  %p3093_p8 = scmp.ne.s32.totalorder %s3054_s22, 0 }
 0x7f5   : > { %p3094_p9 = scmp.ge.s32.totalorder %s1855_s12, 2  ;;  %s1488_s24 = scalar_lea.sflag [#allocation4], %s1487_s16 }
 0x7f7   : > { %p1601_p0 = pnand %p3094_p9, %p3093_p8 }
 0x7f9   : > { %1838 = dma.done.wait (!%p1601_p0), %s1488_s24, 128  }
 0x7fa   : > { %1840 = vsyncadd (!%p1601_p0), %s1488_s24, 4294967168  ;;  %p18_p1 = scmp.ge.s32.totalorder %s1907_s15, 4   ;;  %s3095_s9 = smov %s1847_s10 }
 0x7fb   : > { %s3096_s10 = smov %s1851_s11  ;;  %s3097_s11 = smov %s1919_s18 }
 0x7fc   : > { %s3098_s12 = smov %s1907_s15  ;;  %20 = sbr.rel (!%p18_p1) target bundleno = 7 (0x7), region = 86 }
 0x803   :  { %1493 = vsyncpa [#allocation3], 1 }
 0x804   :  { %1495 = vsyncpa [#allocation3 + $0x1], 1 }
 0x805   :  { %1496 = vsyncpa [#allocation6], 1 }
 0x806   :  { %1498 = vsyncpa [#allocation6 + $0x1], 1 }
 0x807   :  { %1499 = vsyncpa [#allocation4], 1 }
 0x808   :  { %1501 = vsyncpa [#allocation4 + $0x1], 1 }

</bundles_post_ra>
